<compile_context>
chip_gen: v6e
topology: v6e:2x2x1
jax: 0.10.0
libtpu: 0.0.40
codegen_flags: <defaults>
</compile_context>

<pallas_src>
import functools

import jax
import jax.numpy as jnp
from jax import lax
from jax.experimental import pallas as pl
from jax.experimental.pallas import tpu as pltpu


def _block_kernel(xph_ref, dw_ref, b1_ref, pw_ref, b2_ref, o_ref, *,
                  stride, th, wp, m_w, cin, cout, use_roll):
    """One (image, row-tile) step of the fused MobileNet block.

    xph_ref : (stride, stride, 1, hp, wp, cin)  phase-decomposed padded input (bf16)
    dw_ref  : (9, cin)     depthwise 3x3 weights with BN1 scale folded in (f32)
    b1_ref  : (1, cin)     BN1 bias (f32)
    pw_ref  : (cin, cout)  pointwise weights with BN2 scale folded in (bf16)
    b2_ref  : (1, cout)    BN2 bias (f32)
    o_ref   : (1, th*m_w, cout) output slab
    """
    r = pl.program_id(1)
    row0 = r * th

    # Depthwise 3x3 convolution (VPU, f32 math).  One aligned full-width load per
    # (ky, px) phase; the kx offset is an XLU rotate instead of an unaligned slice.
    acc = None
    for ky in range(3):
        py, oy = ky % stride, ky // stride
        rows = pl.ds(row0 + oy, th)
        blocks = {}
        for kx in range(3):
            px, ox = kx % stride, kx // stride
            if px not in blocks:
                blocks[px] = xph_ref[py, px, 0, rows, :, :].astype(jnp.float32)
            blk = blocks[px]                                      # (th, wp, cin)
            if use_roll:
                # rolled[:, j, :] == blk[:, j + ox, :] for j < wp - ox; wrapped columns
                # land at j >= wp - ox >= m_w and are discarded below.
                tap = blk if ox == 0 else pltpu.roll(blk, shift=wp - ox, axis=1)
            else:
                tap = blk[:, ox:ox + m_w, :]      # fallback path: relayout copy per tap
            w_k = dw_ref[3 * ky + kx:3 * ky + kx + 1, :].reshape(1, 1, cin)
            term = tap * w_k
            acc = term if acc is None else acc + term

    if use_roll:
        acc = acc[:, :m_w, :]                     # drop the roll headroom columns

    # BN1 bias + ReLU6 (scale already folded into the depthwise weights).
    y = jnp.clip(acc + b1_ref[...].reshape(1, 1, cin), 0.0, 6.0)

    # Pointwise 1x1 conv == channel matmul on the MXU (bf16 operands, f32 accumulate).
    # m_w is a multiple of 8, so this reshape never forces a relayout.
    y2 = jnp.dot(y.reshape(th * m_w, cin).astype(pw_ref.dtype), pw_ref[...],
                 preferred_element_type=jnp.float32)

    # BN2 bias + ReLU6, stored as a spatial-major slab (bf16 when requested).
    o_ref[0] = jnp.clip(y2 + b2_ref[...], 0.0, 6.0).astype(o_ref.dtype)


def _pick_row_tile(hout, m_w, wp, cin, cout, *, out_bytes, phase_block_bytes,
                   budget_bytes):
    """Largest divisor of hout whose per-step VMEM working set fits the budget.

    Models the resident (double-buffered) phase-image block, the output double buffer,
    the live f32 depthwise blocks/accumulator and the pre/post-MXU intermediates.
    """
    best = 1
    for th in range(1, hout + 1):
        if hout % th:
            continue
        work = (2 * phase_block_bytes                      # phase image block (x2 buffers)
                + 2 * th * m_w * cout * out_bytes          # output double buffer
                + 3 * th * wp * cin * 4                    # tap blocks + f32 accumulator
                + th * m_w * (cin + cout) * 4)             # y and MXU result (f32)
        if work <= budget_bytes:
            best = th
    return best


@functools.lru_cache(maxsize=None)
def _roll_is_usable(th, wp, cin, max_shift):
    """Feature-detect pltpu.roll for our (rank-3, axis=1) use and verify its direction."""
    if max_shift <= 0:
        return False
    try:
        def probe(x_ref, o_ref):
            o_ref[...] = pltpu.roll(x_ref[...], shift=wp - max_shift, axis=1)

        x = jnp.arange(th * wp * cin, dtype=jnp.float32).reshape(th, wp, cin)
        got = jax.block_until_ready(
            pl.pallas_call(probe, out_shape=jax.ShapeDtypeStruct(x.shape, x.dtype))(x))
        want = jnp.roll(x, -max_shift, axis=1)
        keep = wp - max_shift
        return bool(jnp.array_equal(got[:, :keep, :], want[:, :keep, :]))
    except Exception:   # pragma: no cover -- unsupported rotate on this Pallas version
        return False


def _fold_params(dw_w, pw_w, scale1, bias1, scale2, bias2):
    """Fold the (inference) BatchNorm scales into the conv weights.

    Returns kernel-ready operands: dw (9, cin) f32, pw (cin, cout) bf16 (MXU operand)
    and the two bias rows.  The reference path reuses this helper so both sides see
    bit-identical quantization.
    """
    cin = dw_w.shape[-1]
    cout = pw_w.shape[-1]
    dw_folded = (dw_w * scale1[None, None, :]).reshape(9, cin).astype(jnp.float32)
    pw_folded = (pw_w * scale2[None, :]).astype(jnp.bfloat16)
    b1 = bias1.reshape(1, cin).astype(jnp.float32)
    b2 = bias2.reshape(1, cout).astype(jnp.float32)
    return dw_folded, pw_folded, b1, b2


def mobilenet_block_forward(x_nchw, dw_w, pw_w, scale1, bias1, scale2, bias2, stride,
                            out_dtype=jnp.float32):
    """Fused Block forward (inference).

    x_nchw : (N, cin, H, W) f32      dw_w : (3, 3, cin)      pw_w : (cin, cout)
    scale*/bias* : folded BatchNorm (inference mode) per-channel scale / bias.
    """
    if stride not in (1, 2):
        raise ValueError(f"stride should be 1 or 2 instead of {stride}")
    n, cin, h, w = x_nchw.shape
    cout = pw_w.shape[1]
    hout = (h + 2 - 3) // stride + 1
    wout = (w + 2 - 3) // stride + 1
    omax = 2 // stride                       # largest intra-phase tap offset
    m_w = ((wout + 7) // 8) * 8              # matmul / store width (sublane aligned)
    wp = m_w + omax                          # phase-image width (room for the kx taps)
    hp = hout + omax

    # ---- glue (plain XLA, ~1x data movement): NCHW->NHWC, pad, phase decomposition ----
    # Phase image X[py,px][a,b,c] = x_pad[stride*a+py, stride*b+px, c]; tap (ky,kx) of
    # output pixel (i,j) is then X[ky%s, kx%s][i + ky//s, j + kx//s] -> aligned loads +
    # an XLU roll inside the kernel (no strided access, no 9x copy).  Stored in bf16 to
    # halve HBM read traffic; the kernel upcasts to f32 for the VPU math.
    x = jnp.transpose(x_nchw, (0, 2, 3, 1)).astype(jnp.bfloat16)          # NHWC
    x_pad = jnp.pad(x, ((0, 0), (1, 1), (1, 1), (0, 0)))
    phases = []
    for py in range(stride):
        row = []
        for px in range(stride):
            xi = x_pad[:, py::stride, px::stride, :][:, :hp, :wp, :]
            xi = jnp.pad(xi, ((0, 0), (0, hp - xi.shape[1]), (0, wp - xi.shape[2]), (0, 0)))
            row.append(xi)
        phases.append(jnp.stack(row, axis=0))
    x_phases = jnp.stack(phases, axis=0)          # (stride, stride, N, hp, wp, cin) bf16

    # Fold BN scales into the conv weights; only the biases go to the kernel.
    dw_folded, pw_folded, b1, b2 = _fold_params(dw_w, pw_w, scale1, bias1, scale2, bias2)

    # Scoped-VMEM limit: ~70% of physical VMEM (64 MiB on v5e/v6e, ~44 MiB on v7x).
    try:
        vmem_limit = int(min(pltpu.get_tpu_info().vmem_capacity_bytes * 7 // 10,
                             64 * 1024 * 1024))
    except Exception:
        vmem_limit = None

    phase_block_bytes = stride * stride * hp * wp * cin * x_phases.dtype.itemsize
    budget = (vmem_limit or (32 << 20)) // 4
    budget = max(4 << 20, min(budget, 16 << 20))
    th = _pick_row_tile(hout, m_w, wp, cin, cout,
                        out_bytes=jnp.dtype(out_dtype).itemsize,
                        phase_block_bytes=phase_block_bytes,
                        budget_bytes=budget)
    n_row_tiles = hout // th
    # TODO(synk): for the late 7x7/14x14 blocks, additionally block the batch dimension
    # (or fold it into the matmul M) so the pointwise MXU M-dim reaches 256+ on v6e/v7x.
    # TODO(synk): for early blocks with cin < 128, a width-on-lanes depthwise layout
    # would recover the lane underutilization (review item #8).

    roll_ok = _roll_is_usable(th, wp, cin, omax)

    def run(use_roll, use_buffered):
        kernel = functools.partial(_block_kernel, stride=stride, th=th, wp=wp, m_w=m_w,
                                   cin=cin, cout=cout, use_roll=use_roll)
        # Grid-invariant operands: single-buffered (never re-fetched, so the second
        # pipeline buffer is pure VMEM waste -- matters most on v7x's 64 MiB VMEM).
        inv = {"pipeline_mode": pl.Buffered(1)} if use_buffered else {}
        in_specs = [
            # Whole phase image per batch element; its block index ignores the row-tile
            # axis, so it is DMA'd once per image and re-used across row tiles.
            pl.BlockSpec((stride, stride, 1, hp, wp, cin),
                         lambda i, r: (0, 0, i, 0, 0, 0)),
            pl.BlockSpec((9, cin), lambda i, r: (0, 0), **inv),
            pl.BlockSpec((1, cin), lambda i, r: (0, 0), **inv),
            pl.BlockSpec((cin, cout), lambda i, r: (0, 0), **inv),
            pl.BlockSpec((1, cout), lambda i, r: (0, 0), **inv),
        ]
        out = pl.pallas_call(
            kernel,
            out_shape=jax.ShapeDtypeStruct((n, hout * m_w, cout), out_dtype),
            grid_spec=pltpu.PrefetchScalarGridSpec(
                num_scalar_prefetch=0,
                grid=(n, n_row_tiles),
                in_specs=in_specs,
                out_specs=pl.BlockSpec((1, th * m_w, cout), lambda i, r: (i, r, 0)),
            ),
            compiler_params=pltpu.CompilerParams(
                dimension_semantics=("parallel", "parallel"),
                vmem_limit_bytes=vmem_limit),
        )(x_phases, dw_folded, b1, pw_folded, b2)
        return jax.block_until_ready(out)

    # Graceful feature fallback: try (roll, Buffered(1)) first, degrade if this Pallas
    # version rejects either knob.  The fallback paths are numerically identical.
    attempts = [(use_roll, use_buffered)
                for use_roll in ((True, False) if roll_ok else (False,))
                for use_buffered in (True, False)]
    out = None
    last_err = None
    for use_roll, use_buffered in attempts:
        try:
            out = run(use_roll, use_buffered)
            break
        except Exception as e:   # pragma: no cover -- older Pallas / unsupported knob
            last_err = e
    if out is None:
        raise last_err

    # Drop the M-padding columns and return in PyTorch's NCHW convention.
    out = out.reshape(n, hout, m_w, cout)[:, :, :wout, :]
    return jnp.transpose(out, (0, 3, 1, 2))


def reference_forward(x_nchw, dw_w, pw_w, scale1, bias1, scale2, bias2, stride):
    """Pure-XLA reference (lax.conv, f32 HIGHEST math) numerically matched to the
    kernel's bf16-storage / bf16-MXU-operand quantization, so the comparison isolates
    kernel bugs instead of quantization noise."""
    n, cin, h, w = x_nchw.shape
    cout = pw_w.shape[1]
    dw_folded, pw_folded, b1, b2 = _fold_params(dw_w, pw_w, scale1, bias1, scale2, bias2)

    x_q = x_nchw.astype(jnp.bfloat16).astype(jnp.float32)        # kernel stores bf16
    dw_oihw = jnp.transpose(dw_folded.reshape(3, 3, cin), (2, 0, 1))[:, None, :, :]
    y = lax.conv_general_dilated(
        x_q, dw_oihw, (stride, stride), [(1, 1), (1, 1)],
        feature_group_count=cin, dimension_numbers=("NCHW", "OIHW", "NCHW"),
        precision=lax.Precision.HIGHEST)
    y = jnp.clip(y + b1.reshape(1, cin, 1, 1), 0.0, 6.0)

    y_q = y.astype(jnp.bfloat16).astype(jnp.float32)             # kernel feeds bf16 MXU
    pw_oihw = jnp.transpose(pw_folded.astype(jnp.float32), (1, 0))[:, :, None, None]
    z = lax.conv_general_dilated(
        y_q, pw_oihw, (1, 1), [(0, 0), (0, 0)],
        dimension_numbers=("NCHW", "OIHW", "NCHW"),
        precision=lax.Precision.HIGHEST)
    return jnp.clip(z + b2.reshape(1, cout, 1, 1), 0.0, 6.0)


def _make_params(key, cin, cout, eps=1e-5):
    ks = jax.random.split(key, 10)
    dw_w = jax.random.normal(ks[0], (3, 3, cin), jnp.float32) * 0.3      # (kh, kw, cin)
    pw_w = jax.random.normal(ks[1], (cin, cout), jnp.float32) * 0.3      # (cin, cout)
    g1 = 1.0 + 0.1 * jax.random.normal(ks[2], (cin,), jnp.float32)
    b1 = 0.1 * jax.random.normal(ks[3], (cin,), jnp.float32)
    m1 = 0.1 * jax.random.normal(ks[4], (cin,), jnp.float32)
    v1 = jnp.abs(jax.random.normal(ks[5], (cin,), jnp.float32)) + 0.5
    g2 = 1.0 + 0.1 * jax.random.normal(ks[6], (cout,), jnp.float32)
    b2 = 0.1 * jax.random.normal(ks[7], (cout,), jnp.float32)
    m2 = 0.1 * jax.random.normal(ks[8], (cout,), jnp.float32)
    v2 = jnp.abs(jax.random.normal(ks[9], (cout,), jnp.float32)) + 0.5
    scale1 = g1 / jnp.sqrt(v1 + eps)
    bias1 = b1 - m1 * scale1
    scale2 = g2 / jnp.sqrt(v2 + eps)
    bias2 = b2 - m2 * scale2
    return dw_w, pw_w, scale1, bias1, scale2, bias2


if __name__ == "__main__":
    # Block(inp=4, oup=8, stride=s, expand_ratio=1) -- expand_ratio is unused by Block.
    N, CIN, COUT, H, W = 2, 4, 8, 16, 16

    key = jax.random.PRNGKey(0)
    kx, kp = jax.random.split(key)
    x = jax.random.normal(kx, (N, CIN, H, W), jnp.float32)
    dw_w, pw_w, scale1, bias1, scale2, bias2 = _make_params(kp, CIN, COUT)

    for stride in (2, 1):
        out = mobilenet_block_forward(x, dw_w, pw_w, scale1, bias1, scale2, bias2, stride)
        out = jax.block_until_ready(out)
        ref = reference_forward(x, dw_w, pw_w, scale1, bias1, scale2, bias2, stride)
        hout = (H + 2 - 3) // stride + 1
        assert out.shape == ref.shape == (N, COUT, hout, hout), (out.shape, ref.shape)
        # The reference reproduces the kernel's quantization, so the comparison is tight:
        # allclose guards the worst case (a single bf16 rounding tie), the mean-abs check
        # guards against real indexing / accumulation bugs.
        assert jnp.allclose(out, ref, atol=5e-2, rtol=5e-2), f"mismatch (stride={stride})"
        assert float(jnp.mean(jnp.abs(out - ref))) < 1e-3, f"MAE too high (stride={stride})"

    # bf16 output path (used when the next block consumes the activations).
    out_bf16 = mobilenet_block_forward(x, dw_w, pw_w, scale1, bias1, scale2, bias2, 1,
                                       out_dtype=jnp.bfloat16)
    out_bf16 = jax.block_until_ready(out_bf16)
    ref = reference_forward(x, dw_w, pw_w, scale1, bias1, scale2, bias2, 1)
    assert out_bf16.dtype == jnp.bfloat16 and out_bf16.shape == ref.shape
    assert jnp.allclose(out_bf16.astype(jnp.float32), ref, atol=7e-2, rtol=5e-2)

    print("KERNEL_OK")
</pallas_src>

<mosaic_0001>
module attributes {stable_mosaic.version = 11 : i64} {
  func.func @probe(%arg0: memref<8x9x4xf32, #tpu.memory_space<vmem>>, %arg1: memref<8x9x4xf32, #tpu.memory_space<vmem>>) attributes {dimension_semantics = [], scalar_prefetch = 0 : i64, scratch_operands = 0 : i64, tpu.core_type = #tpu.core_type<tc>} {
    %c0 = arith.constant 0 : index
    %c0_0 = arith.constant 0 : index
    %c0_1 = arith.constant 0 : index
    %0 = vector.load %arg0[%c0, %c0_0, %c0_1] : memref<8x9x4xf32, #tpu.memory_space<vmem>>, vector<8x9x4xf32>
    %c8_i32 = arith.constant 8 : i32
    %1 = tpu.dynamic_rotate %0 by %c8_i32 dim 1 : vector<8x9x4xf32>, i32 -> vector<8x9x4xf32>
    %c0_2 = arith.constant 0 : index
    %c0_3 = arith.constant 0 : index
    %c0_4 = arith.constant 0 : index
    %2 = vector.load %arg1[%c0_2, %c0_3, %c0_4] : memref<8x9x4xf32, #tpu.memory_space<vmem>>, vector<8x9x4xf32>
    tpu.vector_store %arg1[%c0_2, %c0_3, %c0_4], %1 {strides = array<i32>} : memref<8x9x4xf32, #tpu.memory_space<vmem>>, vector<8x9x4xf32>,
    return
  }
}

module attributes {stable_mosaic.version = 11 : i64} {
  func.func @_block_kernel(%arg0: i32, %arg1: i32, %arg2: memref<2x2x1x9x9x4xbf16, #tpu.memory_space<vmem>>, %arg3: memref<9x4xf32, #tpu.memory_space<vmem>>, %arg4: memref<1x4xf32, #tpu.memory_space<vmem>>, %arg5: memref<4x8xbf16, #tpu.memory_space<vmem>>, %arg6: memref<1x8xf32, #tpu.memory_space<vmem>>, %arg7: memref<1x64x8xf32, #tpu.memory_space<vmem>>) attributes {dimension_semantics = [#tpu.dimension_semantics<parallel>, #tpu.dimension_semantics<parallel>], iteration_bounds = array<i64: 2, 1>, scalar_prefetch = 0 : i64, scratch_operands = 0 : i64, tpu.core_type = #tpu.core_type<tc>, window_params = [{transform_indices = @transform_0, window_bounds = array<i64: 2, 2, 1, 9, 9, 4>}, {pipeline_mode = #tpu.pipeline_mode<synchronous>, transform_indices = @transform_1, window_bounds = array<i64: 9, 4>}, {pipeline_mode = #tpu.pipeline_mode<synchronous>, transform_indices = @transform_2, window_bounds = array<i64: 1, 4>}, {pipeline_mode = #tpu.pipeline_mode<synchronous>, transform_indices = @transform_3, window_bounds = array<i64: 4, 8>}, {pipeline_mode = #tpu.pipeline_mode<synchronous>, transform_indices = @transform_4, window_bounds = array<i64: 1, 8>}, {transform_indices = @transform_5, window_bounds = array<i64: 1, 64, 8>}]} {
    %c8_i32 = arith.constant 8 : i32
    %0 = arith.muli %arg1, %c8_i32 : i32
    %c0_i32 = arith.constant 0 : i32
    %1 = arith.addi %0, %c0_i32 : i32
    %c0 = arith.constant 0 : index
    %c0_0 = arith.constant 0 : index
    %c0_1 = arith.constant 0 : index
    %2 = arith.index_cast %1 : i32 to index
    %c0_2 = arith.constant 0 : index
    %c0_3 = arith.constant 0 : index
    %3 = vector.load %arg2[%c0, %c0_0, %c0_1, %2, %c0_2, %c0_3] : memref<2x2x1x9x9x4xbf16, #tpu.memory_space<vmem>>, vector<1x1x1x8x9x4xbf16>
    %4 = vector.shape_cast %3 : vector<1x1x1x8x9x4xbf16> to vector<8x9x4xbf16>
    %5 = arith.extf %4 : vector<8x9x4xbf16> to vector<8x9x4xf32>
    %6 = vector.extract_strided_slice %5 {offsets = [0, 0, 0], sizes = [8, 8, 4], strides = [1, 1, 1]} : vector<8x9x4xf32> to vector<8x8x4xf32>
    %c0_4 = arith.constant 0 : index
    %c0_5 = arith.constant 0 : index
    %7 = vector.load %arg3[%c0_4, %c0_5] : memref<9x4xf32, #tpu.memory_space<vmem>>, vector<1x4xf32>
    %8 = vector.shape_cast %7 : vector<1x4xf32> to vector<1x1x4xf32>
    %9 = vector.broadcast %8 : vector<1x1x4xf32> to vector<8x8x4xf32>
    %10 = arith.mulf %6, %9 : vector<8x8x4xf32>
    %c0_6 = arith.constant 0 : index
    %c1 = arith.constant 1 : index
    %c0_7 = arith.constant 0 : index
    %11 = arith.index_cast %1 : i32 to index
    %c0_8 = arith.constant 0 : index
    %c0_9 = arith.constant 0 : index
    %12 = vector.load %arg2[%c0_6, %c1, %c0_7, %11, %c0_8, %c0_9] : memref<2x2x1x9x9x4xbf16, #tpu.memory_space<vmem>>, vector<1x1x1x8x9x4xbf16>
    %13 = vector.shape_cast %12 : vector<1x1x1x8x9x4xbf16> to vector<8x9x4xbf16>
    %14 = arith.extf %13 : vector<8x9x4xbf16> to vector<8x9x4xf32>
    %15 = vector.extract_strided_slice %14 {offsets = [0, 0, 0], sizes = [8, 8, 4], strides = [1, 1, 1]} : vector<8x9x4xf32> to vector<8x8x4xf32>
    %c1_10 = arith.constant 1 : index
    %c0_11 = arith.constant 0 : index
    %16 = vector.load %arg3[%c1_10, %c0_11] : memref<9x4xf32, #tpu.memory_space<vmem>>, vector<1x4xf32>
    %17 = vector.shape_cast %16 : vector<1x4xf32> to vector<1x1x4xf32>
    %18 = vector.broadcast %17 : vector<1x1x4xf32> to vector<8x8x4xf32>
    %19 = arith.mulf %15, %18 : vector<8x8x4xf32>
    %20 = arith.addf %10, %19 : vector<8x8x4xf32>
    %21 = vector.extract_strided_slice %5 {offsets = [0, 1, 0], sizes = [8, 8, 4], strides = [1, 1, 1]} : vector<8x9x4xf32> to vector<8x8x4xf32>
    %c2 = arith.constant 2 : index
    %c0_12 = arith.constant 0 : index
    %22 = vector.load %arg3[%c2, %c0_12] : memref<9x4xf32, #tpu.memory_space<vmem>>, vector<1x4xf32>
    %23 = vector.shape_cast %22 : vector<1x4xf32> to vector<1x1x4xf32>
    %24 = vector.broadcast %23 : vector<1x1x4xf32> to vector<8x8x4xf32>
    %25 = arith.mulf %21, %24 : vector<8x8x4xf32>
    %26 = arith.addf %20, %25 : vector<8x8x4xf32>
    %c0_i32_13 = arith.constant 0 : i32
    %27 = arith.addi %0, %c0_i32_13 : i32
    %c1_14 = arith.constant 1 : index
    %c0_15 = arith.constant 0 : index
    %c0_16 = arith.constant 0 : index
    %28 = arith.index_cast %27 : i32 to index
    %c0_17 = arith.constant 0 : index
    %c0_18 = arith.constant 0 : index
    %29 = vector.load %arg2[%c1_14, %c0_15, %c0_16, %28, %c0_17, %c0_18] : memref<2x2x1x9x9x4xbf16, #tpu.memory_space<vmem>>, vector<1x1x1x8x9x4xbf16>
    %30 = vector.shape_cast %29 : vector<1x1x1x8x9x4xbf16> to vector<8x9x4xbf16>
    %31 = arith.extf %30 : vector<8x9x4xbf16> to vector<8x9x4xf32>
    %32 = vector.extract_strided_slice %31 {offsets = [0, 0, 0], sizes = [8, 8, 4], strides = [1, 1, 1]} : vector<8x9x4xf32> to vector<8x8x4xf32>
    %c3 = arith.constant 3 : index
    %c0_19 = arith.constant 0 : index
    %33 = vector.load %arg3[%c3, %c0_19] : memref<9x4xf32, #tpu.memory_space<vmem>>, vector<1x4xf32>
    %34 = vector.shape_cast %33 : vector<1x4xf32> to vector<1x1x4xf32>
    %35 = vector.broadcast %34 : vector<1x1x4xf32> to vector<8x8x4xf32>
    %36 = arith.mulf %32, %35 : vector<8x8x4xf32>
    %37 = arith.addf %26, %36 : vector<8x8x4xf32>
    %c1_20 = arith.constant 1 : index
    %c1_21 = arith.constant 1 : index
    %c0_22 = arith.constant 0 : index
    %38 = arith.index_cast %27 : i32 to index
    %c0_23 = arith.constant 0 : index
    %c0_24 = arith.constant 0 : index
    %39 = vector.load %arg2[%c1_20, %c1_21, %c0_22, %38, %c0_23, %c0_24] : memref<2x2x1x9x9x4xbf16, #tpu.memory_space<vmem>>, vector<1x1x1x8x9x4xbf16>
    %40 = vector.shape_cast %39 : vector<1x1x1x8x9x4xbf16> to vector<8x9x4xbf16>
    %41 = arith.extf %40 : vector<8x9x4xbf16> to vector<8x9x4xf32>
    %42 = vector.extract_strided_slice %41 {offsets = [0, 0, 0], sizes = [8, 8, 4], strides = [1, 1, 1]} : vector<8x9x4xf32> to vector<8x8x4xf32>
    %c4 = arith.constant 4 : index
    %c0_25 = arith.constant 0 : index
    %43 = vector.load %arg3[%c4, %c0_25] : memref<9x4xf32, #tpu.memory_space<vmem>>, vector<1x4xf32>
    %44 = vector.shape_cast %43 : vector<1x4xf32> to vector<1x1x4xf32>
    %45 = vector.broadcast %44 : vector<1x1x4xf32> to vector<8x8x4xf32>
    %46 = arith.mulf %42, %45 : vector<8x8x4xf32>
    %47 = arith.addf %37, %46 : vector<8x8x4xf32>
    %48 = vector.extract_strided_slice %31 {offsets = [0, 1, 0], sizes = [8, 8, 4], strides = [1, 1, 1]} : vector<8x9x4xf32> to vector<8x8x4xf32>
    %c5 = arith.constant 5 : index
    %c0_26 = arith.constant 0 : index
    %49 = vector.load %arg3[%c5, %c0_26] : memref<9x4xf32, #tpu.memory_space<vmem>>, vector<1x4xf32>
    %50 = vector.shape_cast %49 : vector<1x4xf32> to vector<1x1x4xf32>
    %51 = vector.broadcast %50 : vector<1x1x4xf32> to vector<8x8x4xf32>
    %52 = arith.mulf %48, %51 : vector<8x8x4xf32>
    %53 = arith.addf %47, %52 : vector<8x8x4xf32>
    %c1_i32 = arith.constant 1 : i32
    %54 = arith.addi %0, %c1_i32 : i32
    %c0_27 = arith.constant 0 : index
    %c0_28 = arith.constant 0 : index
    %c0_29 = arith.constant 0 : index
    %55 = arith.index_cast %54 : i32 to index
    %c0_30 = arith.constant 0 : index
    %c0_31 = arith.constant 0 : index
    %56 = vector.load %arg2[%c0_27, %c0_28, %c0_29, %55, %c0_30, %c0_31] : memref<2x2x1x9x9x4xbf16, #tpu.memory_space<vmem>>, vector<1x1x1x8x9x4xbf16>
    %57 = vector.shape_cast %56 : vector<1x1x1x8x9x4xbf16> to vector<8x9x4xbf16>
    %58 = arith.extf %57 : vector<8x9x4xbf16> to vector<8x9x4xf32>
    %59 = vector.extract_strided_slice %58 {offsets = [0, 0, 0], sizes = [8, 8, 4], strides = [1, 1, 1]} : vector<8x9x4xf32> to vector<8x8x4xf32>
    %c6 = arith.constant 6 : index
    %c0_32 = arith.constant 0 : index
    %60 = vector.load %arg3[%c6, %c0_32] : memref<9x4xf32, #tpu.memory_space<vmem>>, vector<1x4xf32>
    %61 = vector.shape_cast %60 : vector<1x4xf32> to vector<1x1x4xf32>
    %62 = vector.broadcast %61 : vector<1x1x4xf32> to vector<8x8x4xf32>
    %63 = arith.mulf %59, %62 : vector<8x8x4xf32>
    %64 = arith.addf %53, %63 : vector<8x8x4xf32>
    %c0_33 = arith.constant 0 : index
    %c1_34 = arith.constant 1 : index
    %c0_35 = arith.constant 0 : index
    %65 = arith.index_cast %54 : i32 to index
    %c0_36 = arith.constant 0 : index
    %c0_37 = arith.constant 0 : index
    %66 = vector.load %arg2[%c0_33, %c1_34, %c0_35, %65, %c0_36, %c0_37] : memref<2x2x1x9x9x4xbf16, #tpu.memory_space<vmem>>, vector<1x1x1x8x9x4xbf16>
    %67 = vector.shape_cast %66 : vector<1x1x1x8x9x4xbf16> to vector<8x9x4xbf16>
    %68 = arith.extf %67 : vector<8x9x4xbf16> to vector<8x9x4xf32>
    %69 = vector.extract_strided_slice %68 {offsets = [0, 0, 0], sizes = [8, 8, 4], strides = [1, 1, 1]} : vector<8x9x4xf32> to vector<8x8x4xf32>
    %c7 = arith.constant 7 : index
    %c0_38 = arith.constant 0 : index
    %70 = vector.load %arg3[%c7, %c0_38] : memref<9x4xf32, #tpu.memory_space<vmem>>, vector<1x4xf32>
    %71 = vector.shape_cast %70 : vector<1x4xf32> to vector<1x1x4xf32>
    %72 = vector.broadcast %71 : vector<1x1x4xf32> to vector<8x8x4xf32>
    %73 = arith.mulf %69, %72 : vector<8x8x4xf32>
    %74 = arith.addf %64, %73 : vector<8x8x4xf32>
    %75 = vector.extract_strided_slice %58 {offsets = [0, 1, 0], sizes = [8, 8, 4], strides = [1, 1, 1]} : vector<8x9x4xf32> to vector<8x8x4xf32>
    %c8 = arith.constant 8 : index
    %c0_39 = arith.constant 0 : index
    %76 = vector.load %arg3[%c8, %c0_39] : memref<9x4xf32, #tpu.memory_space<vmem>>, vector<1x4xf32>
    %77 = vector.shape_cast %76 : vector<1x4xf32> to vector<1x1x4xf32>
    %78 = vector.broadcast %77 : vector<1x1x4xf32> to vector<8x8x4xf32>
    %79 = arith.mulf %75, %78 : vector<8x8x4xf32>
    %80 = arith.addf %74, %79 : vector<8x8x4xf32>
    %c0_40 = arith.constant 0 : index
    %c0_41 = arith.constant 0 : index
    %81 = vector.load %arg4[%c0_40, %c0_41] : memref<1x4xf32, #tpu.memory_space<vmem>>, vector<1x4xf32>
    %82 = vector.shape_cast %81 : vector<1x4xf32> to vector<1x1x4xf32>
    %83 = vector.broadcast %82 : vector<1x1x4xf32> to vector<8x8x4xf32>
    %84 = arith.addf %80, %83 : vector<8x8x4xf32>
    %cst = arith.constant 0.000000e+00 : f32
    %cst_42 = arith.constant 6.000000e+00 : f32
    %85 = vector.broadcast %cst : f32 to vector<8x8x4xf32>
    %86 = arith.maximumf %85, %84 : vector<8x8x4xf32>
    %87 = vector.broadcast %cst_42 : f32 to vector<8x8x4xf32>
    %88 = arith.minimumf %87, %86 : vector<8x8x4xf32>
    %89 = vector.shape_cast %88 : vector<8x8x4xf32> to vector<64x4xf32>
    %90 = arith.truncf %89 : vector<64x4xf32> to vector<64x4xbf16>
    %c0_43 = arith.constant 0 : index
    %c0_44 = arith.constant 0 : index
    %91 = vector.load %arg5[%c0_43, %c0_44] : memref<4x8xbf16, #tpu.memory_space<vmem>>, vector<4x8xbf16>
    %cst_45 = arith.constant dense<0.000000e+00> : vector<64x8xf32>
    %92 = tpu.matmul %90, %91, %cst_45 {dimension_numbers = #tpu.dot_dimension_numbers<[1], [0], [0], [1], [0, 0, 1, 1], [], []>} : vector<64x4xbf16>, vector<4x8xbf16>, vector<64x8xf32> -> vector<64x8xf32>
    %c0_46 = arith.constant 0 : index
    %c0_47 = arith.constant 0 : index
    %93 = vector.load %arg6[%c0_46, %c0_47] : memref<1x8xf32, #tpu.memory_space<vmem>>, vector<1x8xf32>
    %94 = vector.broadcast %93 : vector<1x8xf32> to vector<64x8xf32>
    %95 = arith.addf %92, %94 : vector<64x8xf32>
    %cst_48 = arith.constant 0.000000e+00 : f32
    %cst_49 = arith.constant 6.000000e+00 : f32
    %96 = vector.broadcast %cst_48 : f32 to vector<64x8xf32>
    %97 = arith.maximumf %96, %95 : vector<64x8xf32>
    %98 = vector.broadcast %cst_49 : f32 to vector<64x8xf32>
    %99 = arith.minimumf %98, %97 : vector<64x8xf32>
    %c0_50 = arith.constant 0 : index
    %c0_51 = arith.constant 0 : index
    %c0_52 = arith.constant 0 : index
    %100 = vector.load %arg7[%c0_50, %c0_51, %c0_52] : memref<1x64x8xf32, #tpu.memory_space<vmem>>, vector<1x64x8xf32>
    %101 = vector.shape_cast %100 : vector<1x64x8xf32> to vector<64x8xf32>
    %102 = vector.shape_cast %99 : vector<64x8xf32> to vector<1x64x8xf32>
    tpu.vector_store %arg7[%c0_50, %c0_51, %c0_52], %102 {strides = array<i32>} : memref<1x64x8xf32, #tpu.memory_space<vmem>>, vector<1x64x8xf32>,
    return
  }
  func.func @transform_0(%arg0: i32, %arg1: i32) -> (i32, i32, i32, i32, i32, i32) {
    %c0_i32 = arith.constant 0 : i32
    %c0_i32_0 = arith.constant 0 : i32
    %c0_i32_1 = arith.constant 0 : i32
    %c0_i32_2 = arith.constant 0 : i32
    %c0_i32_3 = arith.constant 0 : i32
    %c0_i32_4 = arith.constant 0 : i32
    return %c0_i32, %c0_i32_0, %arg0, %c0_i32_1, %c0_i32_2, %c0_i32_3 : i32, i32, i32, i32, i32, i32
  }
  func.func @transform_1(%arg0: i32, %arg1: i32) -> (i32, i32) {
    %c0_i32 = arith.constant 0 : i32
    %c0_i32_0 = arith.constant 0 : i32
    %c0_i32_1 = arith.constant 0 : i32
    return %c0_i32, %c0_i32_0 : i32, i32
  }
  func.func @transform_2(%arg0: i32, %arg1: i32) -> (i32, i32) {
    %c0_i32 = arith.constant 0 : i32
    %c0_i32_0 = arith.constant 0 : i32
    %c0_i32_1 = arith.constant 0 : i32
    return %c0_i32, %c0_i32_0 : i32, i32
  }
  func.func @transform_3(%arg0: i32, %arg1: i32) -> (i32, i32) {
    %c0_i32 = arith.constant 0 : i32
    %c0_i32_0 = arith.constant 0 : i32
    %c0_i32_1 = arith.constant 0 : i32
    return %c0_i32, %c0_i32_0 : i32, i32
  }
  func.func @transform_4(%arg0: i32, %arg1: i32) -> (i32, i32) {
    %c0_i32 = arith.constant 0 : i32
    %c0_i32_0 = arith.constant 0 : i32
    %c0_i32_1 = arith.constant 0 : i32
    return %c0_i32, %c0_i32_0 : i32, i32
  }
  func.func @transform_5(%arg0: i32, %arg1: i32) -> (i32, i32, i32) {
    %c0_i32 = arith.constant 0 : i32
    %c0_i32_0 = arith.constant 0 : i32
    return %arg0, %arg1, %c0_i32 : i32, i32, i32
  }
}

module attributes {stable_mosaic.version = 11 : i64} {
  func.func @_block_kernel(%arg0: i32, %arg1: i32, %arg2: memref<2x2x1x9x9x4xbf16, #tpu.memory_space<vmem>>, %arg3: memref<9x4xf32, #tpu.memory_space<vmem>>, %arg4: memref<1x4xf32, #tpu.memory_space<vmem>>, %arg5: memref<4x8xbf16, #tpu.memory_space<vmem>>, %arg6: memref<1x8xf32, #tpu.memory_space<vmem>>, %arg7: memref<1x64x8xf32, #tpu.memory_space<vmem>>) attributes {dimension_semantics = [#tpu.dimension_semantics<parallel>, #tpu.dimension_semantics<parallel>], iteration_bounds = array<i64: 2, 1>, scalar_prefetch = 0 : i64, scratch_operands = 0 : i64, tpu.core_type = #tpu.core_type<tc>, window_params = [{transform_indices = @transform_0, window_bounds = array<i64: 2, 2, 1, 9, 9, 4>}, {pipeline_mode = #tpu.pipeline_mode<synchronous>, transform_indices = @transform_1, window_bounds = array<i64: 9, 4>}, {pipeline_mode = #tpu.pipeline_mode<synchronous>, transform_indices = @transform_2, window_bounds = array<i64: 1, 4>}, {pipeline_mode = #tpu.pipeline_mode<synchronous>, transform_indices = @transform_3, window_bounds = array<i64: 4, 8>}, {pipeline_mode = #tpu.pipeline_mode<synchronous>, transform_indices = @transform_4, window_bounds = array<i64: 1, 8>}, {transform_indices = @transform_5, window_bounds = array<i64: 1, 64, 8>}]} {
    %c8_i32 = arith.constant 8 : i32
    %0 = arith.muli %arg1, %c8_i32 : i32
    %c0_i32 = arith.constant 0 : i32
    %1 = arith.addi %0, %c0_i32 : i32
    %c0 = arith.constant 0 : index
    %c0_0 = arith.constant 0 : index
    %c0_1 = arith.constant 0 : index
    %2 = arith.index_cast %1 : i32 to index
    %c0_2 = arith.constant 0 : index
    %c0_3 = arith.constant 0 : index
    %3 = vector.load %arg2[%c0, %c0_0, %c0_1, %2, %c0_2, %c0_3] : memref<2x2x1x9x9x4xbf16, #tpu.memory_space<vmem>>, vector<1x1x1x8x9x4xbf16>
    %4 = vector.shape_cast %3 : vector<1x1x1x8x9x4xbf16> to vector<8x9x4xbf16>
    %5 = arith.extf %4 : vector<8x9x4xbf16> to vector<8x9x4xf32>
    %6 = vector.extract_strided_slice %5 {offsets = [0, 0, 0], sizes = [8, 8, 4], strides = [1, 1, 1]} : vector<8x9x4xf32> to vector<8x8x4xf32>
    %c0_4 = arith.constant 0 : index
    %c0_5 = arith.constant 0 : index
    %7 = vector.load %arg3[%c0_4, %c0_5] : memref<9x4xf32, #tpu.memory_space<vmem>>, vector<1x4xf32>
    %8 = vector.shape_cast %7 : vector<1x4xf32> to vector<1x1x4xf32>
    %9 = vector.broadcast %8 : vector<1x1x4xf32> to vector<8x8x4xf32>
    %10 = arith.mulf %6, %9 : vector<8x8x4xf32>
    %c0_6 = arith.constant 0 : index
    %c1 = arith.constant 1 : index
    %c0_7 = arith.constant 0 : index
    %11 = arith.index_cast %1 : i32 to index
    %c0_8 = arith.constant 0 : index
    %c0_9 = arith.constant 0 : index
    %12 = vector.load %arg2[%c0_6, %c1, %c0_7, %11, %c0_8, %c0_9] : memref<2x2x1x9x9x4xbf16, #tpu.memory_space<vmem>>, vector<1x1x1x8x9x4xbf16>
    %13 = vector.shape_cast %12 : vector<1x1x1x8x9x4xbf16> to vector<8x9x4xbf16>
    %14 = arith.extf %13 : vector<8x9x4xbf16> to vector<8x9x4xf32>
    %15 = vector.extract_strided_slice %14 {offsets = [0, 0, 0], sizes = [8, 8, 4], strides = [1, 1, 1]} : vector<8x9x4xf32> to vector<8x8x4xf32>
    %c1_10 = arith.constant 1 : index
    %c0_11 = arith.constant 0 : index
    %16 = vector.load %arg3[%c1_10, %c0_11] : memref<9x4xf32, #tpu.memory_space<vmem>>, vector<1x4xf32>
    %17 = vector.shape_cast %16 : vector<1x4xf32> to vector<1x1x4xf32>
    %18 = vector.broadcast %17 : vector<1x1x4xf32> to vector<8x8x4xf32>
    %19 = arith.mulf %15, %18 : vector<8x8x4xf32>
    %20 = arith.addf %10, %19 : vector<8x8x4xf32>
    %21 = vector.extract_strided_slice %5 {offsets = [0, 1, 0], sizes = [8, 8, 4], strides = [1, 1, 1]} : vector<8x9x4xf32> to vector<8x8x4xf32>
    %c2 = arith.constant 2 : index
    %c0_12 = arith.constant 0 : index
    %22 = vector.load %arg3[%c2, %c0_12] : memref<9x4xf32, #tpu.memory_space<vmem>>, vector<1x4xf32>
    %23 = vector.shape_cast %22 : vector<1x4xf32> to vector<1x1x4xf32>
    %24 = vector.broadcast %23 : vector<1x1x4xf32> to vector<8x8x4xf32>
    %25 = arith.mulf %21, %24 : vector<8x8x4xf32>
    %26 = arith.addf %20, %25 : vector<8x8x4xf32>
    %c0_i32_13 = arith.constant 0 : i32
    %27 = arith.addi %0, %c0_i32_13 : i32
    %c1_14 = arith.constant 1 : index
    %c0_15 = arith.constant 0 : index
    %c0_16 = arith.constant 0 : index
    %28 = arith.index_cast %27 : i32 to index
    %c0_17 = arith.constant 0 : index
    %c0_18 = arith.constant 0 : index
    %29 = vector.load %arg2[%c1_14, %c0_15, %c0_16, %28, %c0_17, %c0_18] : memref<2x2x1x9x9x4xbf16, #tpu.memory_space<vmem>>, vector<1x1x1x8x9x4xbf16>
    %30 = vector.shape_cast %29 : vector<1x1x1x8x9x4xbf16> to vector<8x9x4xbf16>
    %31 = arith.extf %30 : vector<8x9x4xbf16> to vector<8x9x4xf32>
    %32 = vector.extract_strided_slice %31 {offsets = [0, 0, 0], sizes = [8, 8, 4], strides = [1, 1, 1]} : vector<8x9x4xf32> to vector<8x8x4xf32>
    %c3 = arith.constant 3 : index
    %c0_19 = arith.constant 0 : index
    %33 = vector.load %arg3[%c3, %c0_19] : memref<9x4xf32, #tpu.memory_space<vmem>>, vector<1x4xf32>
    %34 = vector.shape_cast %33 : vector<1x4xf32> to vector<1x1x4xf32>
    %35 = vector.broadcast %34 : vector<1x1x4xf32> to vector<8x8x4xf32>
    %36 = arith.mulf %32, %35 : vector<8x8x4xf32>
    %37 = arith.addf %26, %36 : vector<8x8x4xf32>
    %c1_20 = arith.constant 1 : index
    %c1_21 = arith.constant 1 : index
    %c0_22 = arith.constant 0 : index
    %38 = arith.index_cast %27 : i32 to index
    %c0_23 = arith.constant 0 : index
    %c0_24 = arith.constant 0 : index
    %39 = vector.load %arg2[%c1_20, %c1_21, %c0_22, %38, %c0_23, %c0_24] : memref<2x2x1x9x9x4xbf16, #tpu.memory_space<vmem>>, vector<1x1x1x8x9x4xbf16>
    %40 = vector.shape_cast %39 : vector<1x1x1x8x9x4xbf16> to vector<8x9x4xbf16>
    %41 = arith.extf %40 : vector<8x9x4xbf16> to vector<8x9x4xf32>
    %42 = vector.extract_strided_slice %41 {offsets = [0, 0, 0], sizes = [8, 8, 4], strides = [1, 1, 1]} : vector<8x9x4xf32> to vector<8x8x4xf32>
    %c4 = arith.constant 4 : index
    %c0_25 = arith.constant 0 : index
    %43 = vector.load %arg3[%c4, %c0_25] : memref<9x4xf32, #tpu.memory_space<vmem>>, vector<1x4xf32>
    %44 = vector.shape_cast %43 : vector<1x4xf32> to vector<1x1x4xf32>
    %45 = vector.broadcast %44 : vector<1x1x4xf32> to vector<8x8x4xf32>
    %46 = arith.mulf %42, %45 : vector<8x8x4xf32>
    %47 = arith.addf %37, %46 : vector<8x8x4xf32>
    %48 = vector.extract_strided_slice %31 {offsets = [0, 1, 0], sizes = [8, 8, 4], strides = [1, 1, 1]} : vector<8x9x4xf32> to vector<8x8x4xf32>
    %c5 = arith.constant 5 : index
    %c0_26 = arith.constant 0 : index
    %49 = vector.load %arg3[%c5, %c0_26] : memref<9x4xf32, #tpu.memory_space<vmem>>, vector<1x4xf32>
    %50 = vector.shape_cast %49 : vector<1x4xf32> to vector<1x1x4xf32>
    %51 = vector.broadcast %50 : vector<1x1x4xf32> to vector<8x8x4xf32>
    %52 = arith.mulf %48, %51 : vector<8x8x4xf32>
    %53 = arith.addf %47, %52 : vector<8x8x4xf32>
    %c1_i32 = arith.constant 1 : i32
    %54 = arith.addi %0, %c1_i32 : i32
    %c0_27 = arith.constant 0 : index
    %c0_28 = arith.constant 0 : index
    %c0_29 = arith.constant 0 : index
    %55 = arith.index_cast %54 : i32 to index
    %c0_30 = arith.constant 0 : index
    %c0_31 = arith.constant 0 : index
    %56 = vector.load %arg2[%c0_27, %c0_28, %c0_29, %55, %c0_30, %c0_31] : memref<2x2x1x9x9x4xbf16, #tpu.memory_space<vmem>>, vector<1x1x1x8x9x4xbf16>
    %57 = vector.shape_cast %56 : vector<1x1x1x8x9x4xbf16> to vector<8x9x4xbf16>
    %58 = arith.extf %57 : vector<8x9x4xbf16> to vector<8x9x4xf32>
    %59 = vector.extract_strided_slice %58 {offsets = [0, 0, 0], sizes = [8, 8, 4], strides = [1, 1, 1]} : vector<8x9x4xf32> to vector<8x8x4xf32>
    %c6 = arith.constant 6 : index
    %c0_32 = arith.constant 0 : index
    %60 = vector.load %arg3[%c6, %c0_32] : memref<9x4xf32, #tpu.memory_space<vmem>>, vector<1x4xf32>
    %61 = vector.shape_cast %60 : vector<1x4xf32> to vector<1x1x4xf32>
    %62 = vector.broadcast %61 : vector<1x1x4xf32> to vector<8x8x4xf32>
    %63 = arith.mulf %59, %62 : vector<8x8x4xf32>
    %64 = arith.addf %53, %63 : vector<8x8x4xf32>
    %c0_33 = arith.constant 0 : index
    %c1_34 = arith.constant 1 : index
    %c0_35 = arith.constant 0 : index
    %65 = arith.index_cast %54 : i32 to index
    %c0_36 = arith.constant 0 : index
    %c0_37 = arith.constant 0 : index
    %66 = vector.load %arg2[%c0_33, %c1_34, %c0_35, %65, %c0_36, %c0_37] : memref<2x2x1x9x9x4xbf16, #tpu.memory_space<vmem>>, vector<1x1x1x8x9x4xbf16>
    %67 = vector.shape_cast %66 : vector<1x1x1x8x9x4xbf16> to vector<8x9x4xbf16>
    %68 = arith.extf %67 : vector<8x9x4xbf16> to vector<8x9x4xf32>
    %69 = vector.extract_strided_slice %68 {offsets = [0, 0, 0], sizes = [8, 8, 4], strides = [1, 1, 1]} : vector<8x9x4xf32> to vector<8x8x4xf32>
    %c7 = arith.constant 7 : index
    %c0_38 = arith.constant 0 : index
    %70 = vector.load %arg3[%c7, %c0_38] : memref<9x4xf32, #tpu.memory_space<vmem>>, vector<1x4xf32>
    %71 = vector.shape_cast %70 : vector<1x4xf32> to vector<1x1x4xf32>
    %72 = vector.broadcast %71 : vector<1x1x4xf32> to vector<8x8x4xf32>
    %73 = arith.mulf %69, %72 : vector<8x8x4xf32>
    %74 = arith.addf %64, %73 : vector<8x8x4xf32>
    %75 = vector.extract_strided_slice %58 {offsets = [0, 1, 0], sizes = [8, 8, 4], strides = [1, 1, 1]} : vector<8x9x4xf32> to vector<8x8x4xf32>
    %c8 = arith.constant 8 : index
    %c0_39 = arith.constant 0 : index
    %76 = vector.load %arg3[%c8, %c0_39] : memref<9x4xf32, #tpu.memory_space<vmem>>, vector<1x4xf32>
    %77 = vector.shape_cast %76 : vector<1x4xf32> to vector<1x1x4xf32>
    %78 = vector.broadcast %77 : vector<1x1x4xf32> to vector<8x8x4xf32>
    %79 = arith.mulf %75, %78 : vector<8x8x4xf32>
    %80 = arith.addf %74, %79 : vector<8x8x4xf32>
    %c0_40 = arith.constant 0 : index
    %c0_41 = arith.constant 0 : index
    %81 = vector.load %arg4[%c0_40, %c0_41] : memref<1x4xf32, #tpu.memory_space<vmem>>, vector<1x4xf32>
    %82 = vector.shape_cast %81 : vector<1x4xf32> to vector<1x1x4xf32>
    %83 = vector.broadcast %82 : vector<1x1x4xf32> to vector<8x8x4xf32>
    %84 = arith.addf %80, %83 : vector<8x8x4xf32>
    %cst = arith.constant 0.000000e+00 : f32
    %cst_42 = arith.constant 6.000000e+00 : f32
    %85 = vector.broadcast %cst : f32 to vector<8x8x4xf32>
    %86 = arith.maximumf %85, %84 : vector<8x8x4xf32>
    %87 = vector.broadcast %cst_42 : f32 to vector<8x8x4xf32>
    %88 = arith.minimumf %87, %86 : vector<8x8x4xf32>
    %89 = vector.shape_cast %88 : vector<8x8x4xf32> to vector<64x4xf32>
    %90 = arith.truncf %89 : vector<64x4xf32> to vector<64x4xbf16>
    %c0_43 = arith.constant 0 : index
    %c0_44 = arith.constant 0 : index
    %91 = vector.load %arg5[%c0_43, %c0_44] : memref<4x8xbf16, #tpu.memory_space<vmem>>, vector<4x8xbf16>
    %cst_45 = arith.constant dense<0.000000e+00> : vector<64x8xf32>
    %92 = tpu.matmul %90, %91, %cst_45 {dimension_numbers = #tpu.dot_dimension_numbers<[1], [0], [0], [1], [0, 0, 1, 1], [], []>} : vector<64x4xbf16>, vector<4x8xbf16>, vector<64x8xf32> -> vector<64x8xf32>
    %c0_46 = arith.constant 0 : index
    %c0_47 = arith.constant 0 : index
    %93 = vector.load %arg6[%c0_46, %c0_47] : memref<1x8xf32, #tpu.memory_space<vmem>>, vector<1x8xf32>
    %94 = vector.broadcast %93 : vector<1x8xf32> to vector<64x8xf32>
    %95 = arith.addf %92, %94 : vector<64x8xf32>
    %cst_48 = arith.constant 0.000000e+00 : f32
    %cst_49 = arith.constant 6.000000e+00 : f32
    %96 = vector.broadcast %cst_48 : f32 to vector<64x8xf32>
    %97 = arith.maximumf %96, %95 : vector<64x8xf32>
    %98 = vector.broadcast %cst_49 : f32 to vector<64x8xf32>
    %99 = arith.minimumf %98, %97 : vector<64x8xf32>
    %c0_50 = arith.constant 0 : index
    %c0_51 = arith.constant 0 : index
    %c0_52 = arith.constant 0 : index
    %100 = vector.load %arg7[%c0_50, %c0_51, %c0_52] : memref<1x64x8xf32, #tpu.memory_space<vmem>>, vector<1x64x8xf32>
    %101 = vector.shape_cast %100 : vector<1x64x8xf32> to vector<64x8xf32>
    %102 = vector.shape_cast %99 : vector<64x8xf32> to vector<1x64x8xf32>
    tpu.vector_store %arg7[%c0_50, %c0_51, %c0_52], %102 {strides = array<i32>} : memref<1x64x8xf32, #tpu.memory_space<vmem>>, vector<1x64x8xf32>,
    return
  }
  func.func @transform_0(%arg0: i32, %arg1: i32) -> (i32, i32, i32, i32, i32, i32) {
    %c0_i32 = arith.constant 0 : i32
    %c0_i32_0 = arith.constant 0 : i32
    %c0_i32_1 = arith.constant 0 : i32
    %c0_i32_2 = arith.constant 0 : i32
    %c0_i32_3 = arith.constant 0 : i32
    %c0_i32_4 = arith.constant 0 : i32
    return %c0_i32, %c0_i32_0, %arg0, %c0_i32_1, %c0_i32_2, %c0_i32_3 : i32, i32, i32, i32, i32, i32
  }
  func.func @transform_1(%arg0: i32, %arg1: i32) -> (i32, i32) {
    %c0_i32 = arith.constant 0 : i32
    %c0_i32_0 = arith.constant 0 : i32
    %c0_i32_1 = arith.constant 0 : i32
    return %c0_i32, %c0_i32_0 : i32, i32
  }
  func.func @transform_2(%arg0: i32, %arg1: i32) -> (i32, i32) {
    %c0_i32 = arith.constant 0 : i32
    %c0_i32_0 = arith.constant 0 : i32
    %c0_i32_1 = arith.constant 0 : i32
    return %c0_i32, %c0_i32_0 : i32, i32
  }
  func.func @transform_3(%arg0: i32, %arg1: i32) -> (i32, i32) {
    %c0_i32 = arith.constant 0 : i32
    %c0_i32_0 = arith.constant 0 : i32
    %c0_i32_1 = arith.constant 0 : i32
    return %c0_i32, %c0_i32_0 : i32, i32
  }
  func.func @transform_4(%arg0: i32, %arg1: i32) -> (i32, i32) {
    %c0_i32 = arith.constant 0 : i32
    %c0_i32_0 = arith.constant 0 : i32
    %c0_i32_1 = arith.constant 0 : i32
    return %c0_i32, %c0_i32_0 : i32, i32
  }
  func.func @transform_5(%arg0: i32, %arg1: i32) -> (i32, i32, i32) {
    %c0_i32 = arith.constant 0 : i32
    %c0_i32_0 = arith.constant 0 : i32
    return %arg0, %arg1, %c0_i32 : i32, i32, i32
  }
}

</mosaic_0001>

<bundles_post_ra>
// kernel: tpu_custom_call.1
= control target key start
LH: loop header
LB: loop body
LE: loop exit
PB: predicated region body
PF: predicated region fallthrough
CT: control target
= control target key end

     0   :  { %vm41_vm0 = vcmask 31745   ;;  %vm24_vm1 = vcmask 1047553   ;;  %vm43_vm2 = vcmask 25600   ;;  %s193_s0 = inlined_call_operand.vmem [shape: f32[8,9,4], index: 0, kind: input, shape index: {}]   ;;  %s194_s1 = inlined_call_operand.vmem [shape: f32[8,9,4], index: 1, kind: output, shape index: {}]  }
   0x1   :  { %v8_v0 = vld [vmem:[%s193_s0] sm:$0xff]  ;;  %v9_v1 = vld [vmem:[%s193_s0 + $0x8] sm:$0x1]  ;;  %v10_v2 = vld [vmem:[%s193_s0 + $0x10] sm:$0xff] }
   0x2   :  { %v25_v3 = vrot.slane %v8_v0, 7  ;;  %42 = vst.msk [vmem:[%s194_s1 - $0x1] sm:$0xfe] %vm41_vm0, %v8_v0  ;;  %v26_v4 = vrot.slane %v10_v2, 7  ;;  %45 = vst.msk [vmem:[%s194_s1 + $0xf] sm:$0xfe] %vm41_vm0, %v10_v2 }
   0x3   :  { %v11_v5 = vld [vmem:[%s193_s0 + $0x18] sm:$0x1]  ;;  %v12_v6 = vld [vmem:[%s193_s0 + $0x20] sm:$0xff]  ;;  %v14_v7 = vld [vmem:[%s193_s0 + $0x30] sm:$0xff] }
   0x4   :  { %v27_v8 = vrot.slane %v12_v6, 7  ;;  %47 = vst.msk [vmem:[%s194_s1 + $0x1f] sm:$0xfe] %vm41_vm0, %v12_v6  ;;  %v13_v9 = vld [vmem:[%s193_s0 + $0x28] sm:$0x1]  ;;  %v28_v10 = vrot.slane %v14_v7, 7  ;;  %v33_v12 = vsel %vm24_vm1, %v25_v3, %v9_v1  ;;  %v34_v13 = vsel %vm24_vm1, %v26_v4, %v11_v5 }
   0x5   :  { %49 = vst.msk [vmem:[%s194_s1 + $0x2f] sm:$0xfe] %vm41_vm0, %v14_v7  ;;  %v15_v11 = vld [vmem:[%s193_s0 + $0x38] sm:$0x1]  ;;  %v16_v14 = vld [vmem:[%s193_s0 + $0x40] sm:$0xff]  ;;  %v18_v16 = vld [vmem:[%s193_s0 + $0x50] sm:$0xff] }
   0x6   :  { %v17_v15 = vld [vmem:[%s193_s0 + $0x48] sm:$0x1]  ;;  %44 = vst.msk [vmem:[%s194_s1 + $0x7] sm:$0x3] %vm43_vm2, %v33_v12  ;;  %46 = vst.msk [vmem:[%s194_s1 + $0x17] sm:$0x3] %vm43_vm2, %v34_v13  ;;  %v35_v17 = vsel %vm24_vm1, %v27_v8, %v13_v9  ;;  %v36_v18 = vsel %vm24_vm1, %v28_v10, %v15_v11 }
   0x7   :  { %v29_v19 = vrot.slane %v16_v14, 7  ;;  %51 = vst.msk [vmem:[%s194_s1 + $0x3f] sm:$0xfe] %vm41_vm0, %v16_v14  ;;  %v30_v20 = vrot.slane %v18_v16, 7  ;;  %53 = vst.msk [vmem:[%s194_s1 + $0x4f] sm:$0xfe] %vm41_vm0, %v18_v16 }
   0x8   :  { %v19_v21 = vld [vmem:[%s193_s0 + $0x58] sm:$0x1]  ;;  %v20_v22 = vld [vmem:[%s193_s0 + $0x60] sm:$0xff]  ;;  %v22_v23 = vld [vmem:[%s193_s0 + $0x70] sm:$0xff]  ;;  %48 = vst.msk [vmem:[%s194_s1 + $0x27] sm:$0x3] %vm43_vm2, %v35_v17 }
   0x9   :  { %50 = vst.msk [vmem:[%s194_s1 + $0x37] sm:$0x3] %vm43_vm2, %v36_v18  ;;  %v31_v24 = vrot.slane %v20_v22, 7  ;;  %v21_v25 = vld [vmem:[%s193_s0 + $0x68] sm:$0x1]  ;;  %v32_v26 = vrot.slane %v22_v23, 7  ;;  %v37_v28 = vsel %vm24_vm1, %v29_v19, %v17_v15  ;;  %v38_v29 = vsel %vm24_vm1, %v30_v20, %v19_v21 }
   0xa   :  { %55 = vst.msk [vmem:[%s194_s1 + $0x5f] sm:$0xfe] %vm41_vm0, %v20_v22  ;;  %57 = vst.msk [vmem:[%s194_s1 + $0x6f] sm:$0xfe] %vm41_vm0, %v22_v23  ;;  %v23_v27 = vld [vmem:[%s193_s0 + $0x78] sm:$0x1] }
   0xb   :  { %52 = vst.msk [vmem:[%s194_s1 + $0x47] sm:$0x3] %vm43_vm2, %v37_v28  ;;  %54 = vst.msk [vmem:[%s194_s1 + $0x57] sm:$0x3] %vm43_vm2, %v38_v29  ;;  %v39_v30 = vsel %vm24_vm1, %v31_v24, %v21_v25  ;;  %v40_v31 = vsel %vm24_vm1, %v32_v26, %v23_v27 }
   0xc   :  { %56 = vst.msk [vmem:[%s194_s1 + $0x67] sm:$0x3] %vm43_vm2, %v39_v30  ;;  %58 = vst.msk [vmem:[%s194_s1 + $0x77] sm:$0x3] %vm43_vm2, %v40_v31 }

// kernel: tpu_custom_call.1
= control target key start
LH: loop header
LB: loop body
LE: loop exit
PB: predicated region body
PF: predicated region fallthrough
CT: control target
= control target key end

     0   :  { %s1565_s18 = smov 0   ;;  %s1567_s19 = smov 0   ;;  %s1963_s0 = inlined_call_operand.vmem [shape: bf16[2,2,2,9,9,4], index: 0, kind: input, shape index: {}]   ;;  %s1964_s1 = inlined_call_operand.vmem [shape: f32[9,4], index: 1, kind: input, shape index: {}]   ;;  %s1965_s2 = inlined_call_operand.vmem [shape: f32[1,4], index: 2, kind: input, shape index: {}]   ;;  %s1966_s3 = inlined_call_operand.vmem [shape: bf16[4,8], index: 3, kind: input, shape index: {}]   ;;  %s1967_s4 = inlined_call_operand.vmem [shape: f32[1,8], index: 4, kind: input, shape index: {}]   ;;  %s1968_s5 = inlined_call_operand.vmem [shape: f32[2,64,8], index: 5, kind: output, shape index: {}]  }
   0x1   :  { %s1569_s20 = smov 0   ;;  %s1571_s21 = smov 0  }
   0x2   :  { %s1573_s22 = smov 0  }
   0x3 LB: > { %s27_s23 = sadd.s32 1, %s1529_s21  ;;  %p41_p1 = scmp.ne.s32.totalorder %s1521_s19, %s1517_s18  ;;  %s1533_s22 = sphi %s1573_s22, %s15_s22   ;;  %s1529_s21 = sphi %s1571_s21, %s1972_s21   ;;  %s1525_s20 = sphi %s1569_s20, %s1971_s20   ;;  %s1521_s19 = sphi %s1567_s19, %s1970_s19   ;;  %s1517_s18 = sphi %s1565_s18, %s1969_s18  }
   0x4   : > { %p29_p0 = scmp.ge.s32.totalorder %s27_s23, 2  ;;  %p42_p2 = scmp.eq.s32.totalorder %s1533_s22, 0 }
   0x5   : > { %s34_s25 = sadd.s32 1, %s1521_s19  ;;  %p1354_p5 = scmp.ge.s32.totalorder %s1533_s22, 2 }
   0x6   : > { %s1974_s23 = smov (%p29_p0, %s27_s23), 0  ;;  %p43_p3 = por %p42_p2, %p41_p1 }
   0x7   : > { %s31_s24 = ssub.s32 %s1529_s21, %s1974_s23  ;;  %191 = sbr.rel (%p1354_p5) target bundleno = 35 (0x23), region = 32 }
   0x8   : > { %p32_p4 = scmp.eq.s32.totalorder %s31_s24, 0 }
   0xa   : > { %s1600_s26 = scalar_select %p32_p4, %s1521_s19, %s34_s25  }
   0xc   : > { %194 = sbr.rel (!%p43_p3) target bundleno = 35 (0x23), region = 36  ;;  %s196_s27 = sand.u32 (%p43_p3), 1, %s1521_s19  }
   0xd   : > { %s1453_s28 = smul.u32 (%p43_p3), 72, %s1529_s21 }
   0xe   : > { %s1452_s29 = smul.u32 (%p43_p3), 288, %s196_s27 }
   0xf   : > { %s1608_s7 = scalar_lea.vmem (%p43_p3), %s1963_s0, %s1453_s28 }
  0x10   : > { %v218_v0 = vld [vmem:[%s1608_s7] sm:$0xff] (%p43_p3)   ;;  %v222_v1 = vld [vmem:[%s1608_s7 + $0x8] sm:$0xff] (%p43_p3)   ;;  %v226_v2 = vld [vmem:[%s1608_s7 + $0x10] sm:$0xff] (%p43_p3)   ;;  %s1613_s8 = scalar_lea.vmem (%p43_p3), [#allocation2], %s1452_s29 }
  0x11   : > { %219 = vst [vmem:[%s1613_s8] sm:$0xff] %v218_v0   ;;  %223 = vst [vmem:[%s1613_s8 + $0x8] sm:$0xff] %v222_v1   ;;  %v230_v3 = vld [vmem:[%s1608_s7 + $0x18] sm:$0xff]   ;;  %v234_v4 = vld [vmem:[%s1608_s7 + $0x20] sm:$0xff]  }
  0x12   : > { %227 = vst [vmem:[%s1613_s8 + $0x10] sm:$0xff] %v226_v2   ;;  %v238_v5 = vld [vmem:[%s1608_s7 + $0x28] sm:$0xff]   ;;  %231 = vst [vmem:[%s1613_s8 + $0x18] sm:$0xff] %v230_v3   ;;  %v242_v6 = vld [vmem:[%s1608_s7 + $0x30] sm:$0xff]  }
  0x13   : > { %235 = vst [vmem:[%s1613_s8 + $0x20] sm:$0xff] %v234_v4   ;;  %239 = vst [vmem:[%s1613_s8 + $0x28] sm:$0xff] %v238_v5   ;;  %v246_v7 = vld [vmem:[%s1608_s7 + $0x38] sm:$0xff]   ;;  %v250_v8 = vld [vmem:[%s1608_s7 + $0x40] sm:$0xff]  }
  0x14   : > { %243 = vst [vmem:[%s1613_s8 + $0x30] sm:$0xff] %v242_v6   ;;  %247 = vst [vmem:[%s1613_s8 + $0x38] sm:$0xff] %v246_v7   ;;  %v254_v9 = vld [vmem:[%s1608_s7 + $0x90] sm:$0xff]   ;;  %v258_v10 = vld [vmem:[%s1608_s7 + $0x98] sm:$0xff]  }
  0x15   : > { %251 = vst [vmem:[%s1613_s8 + $0x40] sm:$0xff] %v250_v8   ;;  %v262_v11 = vld [vmem:[%s1608_s7 + $0xa0] sm:$0xff]   ;;  %255 = vst [vmem:[%s1613_s8 + $0x48] sm:$0xff] %v254_v9   ;;  %v266_v12 = vld [vmem:[%s1608_s7 + $0xa8] sm:$0xff]  }
  0x16   : > { %259 = vst [vmem:[%s1613_s8 + $0x50] sm:$0xff] %v258_v10   ;;  %263 = vst [vmem:[%s1613_s8 + $0x58] sm:$0xff] %v262_v11   ;;  %v270_v13 = vld [vmem:[%s1608_s7 + $0xb0] sm:$0xff]   ;;  %v274_v14 = vld [vmem:[%s1608_s7 + $0xb8] sm:$0xff]  }
  0x17   : > { %267 = vst [vmem:[%s1613_s8 + $0x60] sm:$0xff] %v266_v12   ;;  %271 = vst [vmem:[%s1613_s8 + $0x68] sm:$0xff] %v270_v13   ;;  %v278_v15 = vld [vmem:[%s1608_s7 + $0xc0] sm:$0xff]   ;;  %v282_v16 = vld [vmem:[%s1608_s7 + $0xc8] sm:$0xff]  }
  0x18   : > { %275 = vst [vmem:[%s1613_s8 + $0x70] sm:$0xff] %v274_v14   ;;  %v286_v17 = vld [vmem:[%s1608_s7 + $0xd0] sm:$0xff]   ;;  %279 = vst [vmem:[%s1613_s8 + $0x78] sm:$0xff] %v278_v15   ;;  %v290_v18 = vld [vmem:[%s1608_s7 + $0x120] sm:$0xff]  }
  0x19   : > { %283 = vst [vmem:[%s1613_s8 + $0x80] sm:$0xff] %v282_v16   ;;  %287 = vst [vmem:[%s1613_s8 + $0x88] sm:$0xff] %v286_v17   ;;  %v294_v19 = vld [vmem:[%s1608_s7 + $0x128] sm:$0xff]   ;;  %v298_v20 = vld [vmem:[%s1608_s7 + $0x130] sm:$0xff]  }
  0x1a   : > { %291 = vst [vmem:[%s1613_s8 + $0x90] sm:$0xff] %v290_v18   ;;  %295 = vst [vmem:[%s1613_s8 + $0x98] sm:$0xff] %v294_v19   ;;  %v302_v21 = vld [vmem:[%s1608_s7 + $0x138] sm:$0xff]   ;;  %v306_v22 = vld [vmem:[%s1608_s7 + $0x140] sm:$0xff]  }
  0x1b   : > { %299 = vst [vmem:[%s1613_s8 + $0xa0] sm:$0xff] %v298_v20   ;;  %v310_v23 = vld [vmem:[%s1608_s7 + $0x148] sm:$0xff]   ;;  %303 = vst [vmem:[%s1613_s8 + $0xa8] sm:$0xff] %v302_v21   ;;  %v314_v24 = vld [vmem:[%s1608_s7 + $0x150] sm:$0xff]  }
  0x1c   : > { %307 = vst [vmem:[%s1613_s8 + $0xb0] sm:$0xff] %v306_v22   ;;  %311 = vst [vmem:[%s1613_s8 + $0xb8] sm:$0xff] %v310_v23   ;;  %v318_v25 = vld [vmem:[%s1608_s7 + $0x158] sm:$0xff]   ;;  %v322_v26 = vld [vmem:[%s1608_s7 + $0x160] sm:$0xff]  }
  0x1d   : > { %315 = vst [vmem:[%s1613_s8 + $0xc0] sm:$0xff] %v314_v24   ;;  %319 = vst [vmem:[%s1613_s8 + $0xc8] sm:$0xff] %v318_v25   ;;  %v326_v27 = vld [vmem:[%s1608_s7 + $0x1b0] sm:$0xff]   ;;  %v330_v28 = vld [vmem:[%s1608_s7 + $0x1b8] sm:$0xff]  }
  0x1e   : > { %323 = vst [vmem:[%s1613_s8 + $0xd0] sm:$0xff] %v322_v26   ;;  %v334_v29 = vld [vmem:[%s1608_s7 + $0x1c0] sm:$0xff]   ;;  %327 = vst [vmem:[%s1613_s8 + $0xd8] sm:$0xff] %v326_v27   ;;  %v338_v30 = vld [vmem:[%s1608_s7 + $0x1c8] sm:$0xff]  }
  0x1f   : > { %331 = vst [vmem:[%s1613_s8 + $0xe0] sm:$0xff] %v330_v28   ;;  %335 = vst [vmem:[%s1613_s8 + $0xe8] sm:$0xff] %v334_v29   ;;  %v342_v31 = vld [vmem:[%s1608_s7 + $0x1d0] sm:$0xff]   ;;  %v346_v32 = vld [vmem:[%s1608_s7 + $0x1d8] sm:$0xff]  }
  0x20   : > { %339 = vst [vmem:[%s1613_s8 + $0xf0] sm:$0xff] %v338_v30   ;;  %343 = vst [vmem:[%s1613_s8 + $0xf8] sm:$0xff] %v342_v31   ;;  %v350_v33 = vld [vmem:[%s1608_s7 + $0x1e0] sm:$0xff]   ;;  %v354_v34 = vld [vmem:[%s1608_s7 + $0x1e8] sm:$0xff]  }
  0x21   : > { %347 = vst [vmem:[%s1613_s8 + $0x100] sm:$0xff] %v346_v32   ;;  %v358_v35 = vld [vmem:[%s1608_s7 + $0x1f0] sm:$0xff]   ;;  %351 = vst [vmem:[%s1613_s8 + $0x108] sm:$0xff] %v350_v33  }
  0x22   : > { %355 = vst [vmem:[%s1613_s8 + $0x110] sm:$0xff] %v354_v34   ;;  %359 = vst [vmem:[%s1613_s8 + $0x118] sm:$0xff] %v358_v35  }
  0x23 PF: > { %p1356_p6 = scmp.ge.s32.totalorder %s1533_s22, 1  ;;  %p528_p7 = scmp.lt.s32.totalorder %s1533_s22, 3 }
  0x25   : > { %p529_p8 = pnand %p1356_p6, %p528_p7 }
  0x26   : > { %s535_s11 = sand.u32 (!%p529_p8), 1, %s1517_s18   ;;  %p567_p9 = scmp.lt.s32.totalorder (!%p529_p8), %s1525_s20, 1 }
  0x27   : > { %532 = sbr.rel (%p529_p8) target bundleno = 346 (0x15a), region = 77 }
  0x28   : > { %s1454_s12 = smul.u32 (!%p529_p8), 288, %s535_s11 }
  0x2a   : > { %s1705_s18 = scalar_lea.vmem (!%p529_p8), [#allocation2], %s1454_s12 }
  0x2c   : > { %v1126_v36 = vld [vmem:[%s1966_s3] sm:$0x3]  ;;  %vm1147_vm0 = vcmask 1041408   ;;  %v1703_v40 = vld [vmem:[%s1964_s1 + $0x2] ss:$0 sm:$0xff]  ;;  %vm703_vm1 = vcmask 1046528  }
  0x2d   : > { %1450 = vmatprep.subr.msk.bf16.mxu0 %vm1147_vm0, %v1126_v36  ;;  %1451 = vmatprep.subr.msk.bf16.mxu1 %vm1147_vm0, %v1126_v36  ;;  %v1149_v37 = vsel %vm1147_vm0, %v1126_v36, 0  ;;  %v1693_v38 = vld [vmem:[%s1964_s1] ss:$0 sm:$0xff]  ;;  %v1698_v39 = vld [vmem:[%s1964_s1 + $0x1] ss:$0 sm:$0xff]  ;;  %vm1134_vm2 = vcmask 31744  }
  0x2e   : > { %1439 = vmatpush3.bf16.msra.mxu0 %v1149_v37  ;;  %1449 = vmatpush3.bf16.msra.mxu1 %v1149_v37  ;;  %v581_v41 = vld [vmem:[%s1705_s18] ss:$8 sps:$4 sm:$0xff]   ;;  %v582_v42 = vld [vmem:[%s1705_s18 + $0x4] sm:$0x1]  ;;  %v584_v43 = vld [vmem:[%s1705_s18 + $0xc] sm:$0x1] }
  0x2f   : > { %v597_v44 = vunpack.c.l.bf16 %v581_v41  ;;  %v598_v45 = vunpack.c.l.bf16 %v582_v42  ;;  %v599_v46 = vunpack.c.h.bf16 %v581_v41  ;;  %v600_v47 = vunpack.c.l.bf16 %v584_v43  ;;  %v1360_v48 = vld [vmem:[%s1705_s18 + $0x48] ss:$8 sps:$4 sm:$0xff]   ;;  %v1371_v50 = vld [vmem:[%s1705_s18 + $0x94] sm:$0x1]  ;;  %v1373_v53 = vld [vmem:[%s1705_s18 + $0x9c] sm:$0x1] }
  0x30   : > { %v1370_v49 = vld [vmem:[%s1705_s18 + $0x90] ss:$8 sps:$4 sm:$0xff]   ;;  %v637_v51 = vunpack.c.l.bf16 %v1360_v48  ;;  %v638_v52 = vunpack.c.h.bf16 %v1360_v48  ;;  %v764_v55 = vunpack.c.l.bf16 %v1371_v50  ;;  %v1725_v0 = vld [vmem:[%s1964_s1 + $0x3] ss:$0 sm:$0xff]  ;;  %v766_v5 = vunpack.c.l.bf16 %v1373_v53  ;;  %v1731_v6 = vld [vmem:[%s1964_s1 + $0x5] ss:$0 sm:$0xff] }
  0x31   : > { %v763_v54 = vunpack.c.l.bf16 %v1370_v49  ;;  %v618_v56 = vmul.f32 %v1693_v38, %v597_v44  ;;  %v619_v57 = vmul.f32 %v1693_v38, %v599_v46  ;;  %v671_v58 = vmul.f32 %v1703_v40, %v597_v44  ;;  %v1387_v1 = vld [vmem:[%s1705_s18 + $0xd8] ss:$8 sps:$4 sm:$0xff]   ;;  %v1736_v11 = vld [vmem:[%s1964_s1 + $0x4] ss:$0 sm:$0xff]  ;;  %v1397_v20 = vld [vmem:[%s1705_s18 + $0x8] ss:$8 sps:$4 sm:$0xff]  }
  0x32   : > { %v672_v59 = vmul.f32 %v1703_v40, %v598_v45  ;;  %v650_v60 = vmul.f32 %v1698_v39, %v637_v51  ;;  %v651_v61 = vmul.f32 %v1698_v39, %v638_v52  ;;  %v673_v62 = vmul.f32 %v1703_v40, %v599_v46  ;;  %v1398_v25 = vld [vmem:[%s1705_s18 + $0xc] sm:$0x1]  ;;  %v1400_v30 = vld [vmem:[%s1705_s18 + $0x14] sm:$0x1]  ;;  %v1754_v31 = vld [vmem:[%s1964_s1 + $0x6] ss:$0 sm:$0xff] }
  0x33   : > { %v674_v63 = vmul.f32 %v1703_v40, %v600_v47  ;;  %v704_v2 = vrot.slane %v671_v58, 1  ;;  %v765_v4 = vunpack.c.h.bf16 %v1370_v49  ;;  %v784_v13 = vmul.f32 %v1725_v0, %v763_v54  ;;  %v1414_v36 = vld [vmem:[%s1705_s18 + $0x50] ss:$8 sps:$4 sm:$0xff]   ;;  %v1760_v44 = vld [vmem:[%s1964_s1 + $0x8] ss:$0 sm:$0xff]  ;;  %s1976_s20 = smov (!%p567_p9, %s1525_s20), 1 }
  0x34   : > { %v705_v3 = vrot.slane %v672_v59, 1  ;;  %v658_v7 = vadd.f32 %v650_v60, %v618_v56  ;;  %v659_v8 = vadd.f32 %v651_v61, %v619_v57  ;;  %v707_v9 = vrot.slane %v673_v62, 1  ;;  %v1767_v49 = vld [vmem:[%s1964_s1 + $0x7] ss:$0 sm:$0xff]  ;;  %v589_v58 = vld [vmem:[%s1705_s18 + $0x20] ss:$8 sps:$4 sm:$0xff]  }
  0x35   : > { %v708_v10 = vrot.slane %v674_v63, 1  ;;  %v785_v14 = vmul.f32 %v1725_v0, %v765_v4  ;;  %v811_v15 = vunpack.c.l.bf16 %v1387_v1  ;;  %v812_v18 = vunpack.c.h.bf16 %v1387_v1  ;;  %v590_v63 = vld [vmem:[%s1705_s18 + $0x24] sm:$0x1]  ;;  %s1432_s17 = sshll.u32 %s1976_s20, 6 }
  0x36   : > { %v706_v12 = vsel %vm703_vm1, %v704_v2, %v705_v3  ;;  %v845_v19 = vmul.f32 %v1731_v6, %v763_v54  ;;  %v846_v23 = vmul.f32 %v1731_v6, %v764_v55  ;;  %v847_v24 = vmul.f32 %v1731_v6, %v765_v4  ;;  %s1930_s25 = scalar_lea.vmem %s1968_s5, %s1432_s17 }
  0x37   : > { %v709_v16 = vsel %vm703_vm1, %v707_v9, %v708_v10  ;;  %v736_v17 = vadd.f32 %v706_v12, %v658_v7  ;;  %v824_v22 = vmul.f32 %v1736_v11, %v811_v15  ;;  %v825_v27 = vmul.f32 %v1736_v11, %v812_v18  ;;  %v1364_v12 = vld [vmem:[%s1705_s18 + $0x68] ss:$8 sps:$4 sm:$0xff]   ;;  %v1785_v15 = vld [vmem:[%s1965_s2] ss:$0 sm:$0xff] }
  0x38   : > { %v737_v21 = vadd.f32 %v709_v16, %v659_v8  ;;  %v848_v28 = vmul.f32 %v1731_v6, %v766_v5  ;;  %v877_v29 = vrot.slane %v845_v19, 1  ;;  %v878_v33 = vrot.slane %v846_v23, 1  ;;  %v592_v5 = vld [vmem:[%s1705_s18 + $0x2c] sm:$0x1] }
  0x39   : > { %v792_v26 = vadd.f32 %v784_v13, %v736_v17  ;;  %v880_v34 = vrot.slane %v847_v24, 1  ;;  %v937_v35 = vunpack.c.l.bf16 %v1397_v20  ;;  %v938_v42 = vunpack.c.l.bf16 %v1398_v25 }
  0x3a   : > { %v793_v32 = vadd.f32 %v785_v14, %v737_v21  ;;  %v881_v41 = vrot.slane %v848_v28, 1  ;;  %v939_v43 = vunpack.c.h.bf16 %v1397_v20  ;;  %v879_v46 = vsel %vm703_vm1, %v877_v29, %v878_v33 }
  0x3b   : > { %v832_v37 = vadd.f32 %v824_v22, %v792_v26  ;;  %v940_v47 = vunpack.c.l.bf16 %v1400_v30  ;;  %v958_v48 = vmul.f32 %v1754_v31, %v937_v35  ;;  %v985_v53 = vunpack.c.l.bf16 %v1414_v36 }
  0x3c   : > { %v833_v45 = vadd.f32 %v825_v27, %v793_v32  ;;  %v882_v50 = vsel %vm703_vm1, %v880_v34, %v881_v41  ;;  %v959_v52 = vmul.f32 %v1754_v31, %v939_v43  ;;  %v986_v55 = vunpack.c.h.bf16 %v1414_v36  ;;  %v1379_v36 = vld [vmem:[%s1705_s18 + $0xb4] sm:$0x1] }
  0x3d   : > { %v909_v51 = vadd.f32 %v879_v46, %v832_v37  ;;  %v1019_v56 = vmul.f32 %v1760_v44, %v937_v35  ;;  %v1020_v57 = vmul.f32 %v1760_v44, %v938_v42  ;;  %v998_v60 = vmul.f32 %v1767_v49, %v985_v53  ;;  %v1378_v35 = vld [vmem:[%s1705_s18 + $0xb0] ss:$8 sps:$4 sm:$0xff]  }
  0x3e   : > { %v910_v54 = vadd.f32 %v882_v50, %v833_v45  ;;  %v1021_v61 = vmul.f32 %v1760_v44, %v939_v43  ;;  %v1022_v62 = vmul.f32 %v1760_v44, %v940_v47  ;;  %v999_v2 = vmul.f32 %v1767_v49, %v986_v55  ;;  %v1381_v50 = vld [vmem:[%s1705_s18 + $0xbc] sm:$0x1] }
  0x3f   : > { %v966_v59 = vadd.f32 %v958_v48, %v909_v51  ;;  %v1051_v3 = vrot.slane %v1019_v56, 1  ;;  %v1052_v4 = vrot.slane %v1020_v57, 1  ;;  %v605_v10 = vunpack.c.l.bf16 %v589_v58  ;;  %v1391_v51 = vld [vmem:[%s1705_s18 + $0xf8] ss:$8 sps:$4 sm:$0xff]  }
  0x40   : > { %v967_v1 = vadd.f32 %v959_v52, %v910_v54  ;;  %v1054_v8 = vrot.slane %v1021_v61, 1  ;;  %v1055_v9 = vrot.slane %v1022_v62, 1  ;;  %v606_v16 = vunpack.c.l.bf16 %v590_v63 }
  0x41   : > { %v1006_v7 = vadd.f32 %v998_v60, %v966_v59  ;;  %v1053_v14 = vsel %vm703_vm1, %v1051_v3, %v1052_v4  ;;  %v607_v17 = vunpack.c.h.bf16 %v589_v58  ;;  %v608_v20 = vunpack.c.l.bf16 %v592_v5  ;;  %v1405_v5 = vld [vmem:[%s1705_s18 + $0x28] ss:$8 sps:$4 sm:$0xff]  }
  0x42   : > { %v1007_v13 = vadd.f32 %v999_v2, %v967_v1  ;;  %v1056_v18 = vsel %vm703_vm1, %v1054_v8, %v1055_v9  ;;  %v622_v21 = vmul.f32 %v1693_v38, %v605_v10  ;;  %v641_v24 = vunpack.c.l.bf16 %v1364_v12 }
  0x43   : > { %v1083_v19 = vadd.f32 %v1053_v14, %v1006_v7  ;;  %v623_v23 = vmul.f32 %v1693_v38, %v607_v17  ;;  %v642_v25 = vunpack.c.h.bf16 %v1364_v12  ;;  %v679_v27 = vmul.f32 %v1703_v40, %v605_v10  ;;  %v1406_v12 = vld [vmem:[%s1705_s18 + $0x2c] sm:$0x1] }
  0x44   : > { %v1084_v22 = vadd.f32 %v1056_v18, %v1007_v13  ;;  %v680_v28 = vmul.f32 %v1703_v40, %v606_v16  ;;  %v681_v29 = vmul.f32 %v1703_v40, %v607_v17  ;;  %v654_v32 = vmul.f32 %v1698_v39, %v641_v24  ;;  %v1408_v18 = vld [vmem:[%s1705_s18 + $0x34] sm:$0x1] }
  0x45   : > { %v1098_v26 = vadd.f32 %v1785_v15, %v1083_v19  ;;  %v655_v33 = vmul.f32 %v1698_v39, %v642_v25  ;;  %v682_v34 = vmul.f32 %v1703_v40, %v608_v20  ;;  %v716_v41 = vrot.slane %v679_v27, 1  ;;  %v1418_v19 = vld [vmem:[%s1705_s18 + $0x70] ss:$8 sps:$4 sm:$0xff]  }
  0x46   : > { %v1099_v30 = vadd.f32 %v1785_v15, %v1084_v22  ;;  %v717_v42 = vrot.slane %v680_v28, 1  ;;  %v719_v43 = vrot.slane %v681_v29, 1  ;;  %v662_v46 = vadd.f32 %v654_v32, %v622_v21 }
  0x47   : > { %v1106_v37 = vmax.f32 %v1098_v26, 0.0  ;;  %v663_v47 = vadd.f32 %v655_v33, %v623_v23  ;;  %v720_v48 = vrot.slane %v682_v34, 1  ;;  %v771_v54 = vunpack.c.l.bf16 %v1378_v35 }
  0x48   : > { %v1107_v45 = vmax.f32 %v1099_v30, 0.0  ;;  %v718_v53 = vsel %vm703_vm1, %v716_v41, %v717_v42  ;;  %v772_v55 = vunpack.c.l.bf16 %v1379_v36  ;;  %v773_v59 = vunpack.c.h.bf16 %v1378_v35 }
  0x49   : > { %v1114_v52 = vmin.f32 %v1106_v37, 6.0  ;;  %v721_v57 = vsel %vm703_vm1, %v719_v43, %v720_v48  ;;  %v740_v58 = vadd.f32 %v718_v53, %v662_v46  ;;  %v774_v61 = vunpack.c.l.bf16 %v1381_v50  ;;  %v585_v37 = vld [vmem:[%s1705_s18 + $0x10] ss:$8 sps:$4 sm:$0xff]   ;;  %v586_v46 = vld [vmem:[%s1705_s18 + $0x14] sm:$0x1] }
  0x4a   : > { %v1115_v56 = vmin.f32 %v1107_v45, 6.0  ;;  %v741_v60 = vadd.f32 %v721_v57, %v663_v47  ;;  %v788_v62 = vmul.f32 %v1725_v0, %v771_v54  ;;  %v815_v63 = vunpack.c.l.bf16 %v1391_v51  ;;  %v1362_v57 = vld [vmem:[%s1705_s18 + $0x58] ss:$8 sps:$4 sm:$0xff]  }
  0x4b   : > { %v789_v2 = vmul.f32 %v1725_v0, %v773_v59  ;;  %v816_v3 = vunpack.c.h.bf16 %v1391_v51  ;;  %v853_v4 = vmul.f32 %v1731_v6, %v771_v54  ;;  %v854_v9 = vmul.f32 %v1731_v6, %v772_v55 }
  0x4c   : > { %v1122_v1 = vpack.c.bf16 %v1115_v56, %v1114_v52  ;;  %v796_v7 = vadd.f32 %v788_v62, %v740_v58  ;;  %v828_v8 = vmul.f32 %v1736_v11, %v815_v63  ;;  %v855_v10 = vmul.f32 %v1731_v6, %v773_v59  ;;  %v588_v52 = vld [vmem:[%s1705_s18 + $0x1c] sm:$0x1] }
  0x4d   : > { %v797_v13 = vadd.f32 %v789_v2, %v741_v60  ;;  %v829_v14 = vmul.f32 %v1736_v11, %v816_v3  ;;  %v856_v16 = vmul.f32 %v1731_v6, %v774_v61  ;;  %v889_v17 = vrot.slane %v853_v4, 1 }
  0x4e   : > { %1440 = vmatprep.mubr.msk.bf16.mxu0 %vm1134_vm2, %v1122_v1  ;;  %v836_v20 = vadd.f32 %v828_v8, %v796_v7  ;;  %v890_v21 = vrot.slane %v854_v9, 1  ;;  %v892_v22 = vrot.slane %v855_v10, 1  ;;  %v945_v23 = vunpack.c.l.bf16 %v1405_v5 }
  0x4f   : > { %v837_v24 = vadd.f32 %v829_v14, %v797_v13  ;;  %v893_v25 = vrot.slane %v856_v16, 1  ;;  %v946_v26 = vunpack.c.l.bf16 %v1406_v12  ;;  %v947_v27 = vunpack.c.h.bf16 %v1405_v5 }
  0x50   : > { %v891_v28 = vsel %vm703_vm1, %v889_v17, %v890_v21  ;;  %v948_v29 = vunpack.c.l.bf16 %v1408_v18  ;;  %v962_v30 = vmul.f32 %v1754_v31, %v945_v23  ;;  %v989_v32 = vunpack.c.l.bf16 %v1418_v19  ;;  %v1374_v18 = vld [vmem:[%s1705_s18 + $0xa0] ss:$8 sps:$4 sm:$0xff]  }
  0x51   : > { %v894_v33 = vsel %vm703_vm1, %v892_v22, %v893_v25  ;;  %v913_v34 = vadd.f32 %v891_v28, %v836_v20  ;;  %v963_v35 = vmul.f32 %v1754_v31, %v947_v27  ;;  %v990_v36 = vunpack.c.h.bf16 %v1418_v19  ;;  %v1377_v28 = vld [vmem:[%s1705_s18 + $0xac] sm:$0x1] }
  0x52   : > { %v914_v41 = vadd.f32 %v894_v33, %v837_v24  ;;  %v1002_v42 = vmul.f32 %v1767_v49, %v989_v32  ;;  %v1027_v43 = vmul.f32 %v1760_v44, %v945_v23  ;;  %v1028_v45 = vmul.f32 %v1760_v44, %v946_v26  ;;  %v1375_v23 = vld [vmem:[%s1705_s18 + $0xa4] sm:$0x1] }
  0x53   : > { %v970_v47 = vadd.f32 %v962_v30, %v913_v34  ;;  %v1003_v48 = vmul.f32 %v1767_v49, %v990_v36  ;;  %v1029_v50 = vmul.f32 %v1760_v44, %v947_v27  ;;  %v1030_v51 = vmul.f32 %v1760_v44, %v948_v29  ;;  %v1389_v34 = vld [vmem:[%s1705_s18 + $0xe8] ss:$8 sps:$4 sm:$0xff]  }
  0x54   : > { %v971_v53 = vadd.f32 %v963_v35, %v914_v41  ;;  %v1063_v54 = vrot.slane %v1027_v43, 1  ;;  %v1064_v55 = vrot.slane %v1028_v45, 1  ;;  %v601_v56 = vunpack.c.l.bf16 %v585_v37 }
  0x55   : > { %v1010_v58 = vadd.f32 %v1002_v42, %v970_v47  ;;  %v1066_v59 = vrot.slane %v1029_v50, 1  ;;  %v1067_v60 = vrot.slane %v1030_v51, 1  ;;  %v602_v61 = vunpack.c.l.bf16 %v586_v46 }
  0x56   : > { %v1011_v62 = vadd.f32 %v1003_v48, %v971_v53  ;;  %v1065_v63 = vsel %vm703_vm1, %v1063_v54, %v1064_v55  ;;  %v603_v1 = vunpack.c.h.bf16 %v585_v37  ;;  %v604_v2 = vunpack.c.l.bf16 %v588_v52 }
  0x57   : > { %v1068_v3 = vsel %vm703_vm1, %v1066_v59, %v1067_v60  ;;  %v1087_v4 = vadd.f32 %v1065_v63, %v1010_v58  ;;  %v620_v5 = vmul.f32 %v1693_v38, %v601_v56  ;;  %v639_v7 = vunpack.c.l.bf16 %v1362_v57 }
  0x58   : > { %v1088_v8 = vadd.f32 %v1068_v3, %v1011_v62  ;;  %v621_v9 = vmul.f32 %v1693_v38, %v603_v1  ;;  %v640_v10 = vunpack.c.h.bf16 %v1362_v57  ;;  %v675_v12 = vmul.f32 %v1703_v40, %v601_v56  ;;  %v1401_v56 = vld [vmem:[%s1705_s18 + $0x18] ss:$8 sps:$4 sm:$0xff]   ;;  %v1402_v57 = vld [vmem:[%s1705_s18 + $0x1c] sm:$0x1]  ;;  %v1404_v3 = vld [vmem:[%s1705_s18 + $0x24] sm:$0x1] }
  0x59   : > { %v1102_v13 = vadd.f32 %v1785_v15, %v1087_v4  ;;  %v652_v14 = vmul.f32 %v1698_v39, %v639_v7  ;;  %v676_v16 = vmul.f32 %v1703_v40, %v602_v61  ;;  %v677_v17 = vmul.f32 %v1703_v40, %v603_v1  ;;  %v1416_v4 = vld [vmem:[%s1705_s18 + $0x60] ss:$8 sps:$4 sm:$0xff]  }
  0x5a   : > { %v1103_v19 = vadd.f32 %v1785_v15, %v1088_v8  ;;  %v653_v20 = vmul.f32 %v1698_v39, %v640_v10  ;;  %v678_v21 = vmul.f32 %v1703_v40, %v604_v2  ;;  %v710_v22 = vrot.slane %v675_v12, 1 }
  0x5b   : > { %v1110_v24 = vmax.f32 %v1102_v13, 0.0  ;;  %v660_v25 = vadd.f32 %v652_v14, %v620_v5  ;;  %v711_v26 = vrot.slane %v676_v16, 1  ;;  %v713_v27 = vrot.slane %v677_v17, 1 }
  0x5c   : > { %v1111_v29 = vmax.f32 %v1103_v19, 0.0  ;;  %v661_v30 = vadd.f32 %v653_v20, %v621_v9  ;;  %v714_v32 = vrot.slane %v678_v21, 1  ;;  %v767_v33 = vunpack.c.l.bf16 %v1374_v18 }
  0x5d   : > { %v1118_v35 = vmin.f32 %v1110_v24, 6.0  ;;  %v712_v36 = vsel %vm703_vm1, %v710_v22, %v711_v26  ;;  %v768_v37 = vunpack.c.l.bf16 %v1375_v23  ;;  %v769_v41 = vunpack.c.h.bf16 %v1374_v18  ;;  %v593_v24 = vld [vmem:[%s1705_s18 + $0x30] ss:$8 sps:$4 sm:$0xff]  }
  0x5e   : > { %v1119_v42 = vmin.f32 %v1111_v29, 6.0  ;;  %v715_v43 = vsel %vm703_vm1, %v713_v27, %v714_v32  ;;  %v738_v45 = vadd.f32 %v712_v36, %v660_v25  ;;  %v770_v46 = vunpack.c.l.bf16 %v1377_v28  ;;  %v594_v29 = vld [vmem:[%s1705_s18 + $0x34] sm:$0x1] }
  0x5f   : > { %v739_v47 = vadd.f32 %v715_v43, %v661_v30  ;;  %v786_v48 = vmul.f32 %v1725_v0, %v767_v33  ;;  %v787_v50 = vmul.f32 %v1725_v0, %v769_v41  ;;  %v813_v51 = vunpack.c.l.bf16 %v1389_v34  ;;  %v1366_v43 = vld [vmem:[%s1705_s18 + $0x78] ss:$8 sps:$4 sm:$0xff]  }
  0x60   : > { %v1124_v52 = vpack.c.bf16 %v1119_v42, %v1118_v35  ;;  %v814_v53 = vunpack.c.h.bf16 %v1389_v34  ;;  %v849_v54 = vmul.f32 %v1731_v6, %v767_v33  ;;  %v850_v55 = vmul.f32 %v1731_v6, %v768_v37  ;;  %v596_v35 = vld [vmem:[%s1705_s18 + $0x3c] sm:$0x1] }
  0x61   : > { %v794_v58 = vadd.f32 %v786_v48, %v738_v45  ;;  %v795_v59 = vadd.f32 %v787_v50, %v739_v47  ;;  %v826_v60 = vmul.f32 %v1736_v11, %v813_v51  ;;  %v851_v61 = vmul.f32 %v1731_v6, %v769_v41 }
  0x62   : > { %1444 = vmatprep.mubr.msk.bf16.mxu1 %vm1134_vm2, %v1124_v52  ;;  %v827_v62 = vmul.f32 %v1736_v11, %v814_v53  ;;  %v852_v63 = vmul.f32 %v1731_v6, %v770_v46  ;;  %v883_v1 = vrot.slane %v849_v54, 1  ;;  %v884_v2 = vrot.slane %v850_v55, 1 }
  0x63   : > { %v834_v5 = vadd.f32 %v826_v60, %v794_v58  ;;  %v886_v7 = vrot.slane %v851_v61, 1  ;;  %v941_v8 = vunpack.c.l.bf16 %v1401_v56  ;;  %v942_v9 = vunpack.c.l.bf16 %v1402_v57 }
  0x64   : > { %v835_v10 = vadd.f32 %v827_v62, %v795_v59  ;;  %v885_v12 = vsel %vm703_vm1, %v883_v1, %v884_v2  ;;  %v887_v13 = vrot.slane %v852_v63, 1  ;;  %v943_v14 = vunpack.c.h.bf16 %v1401_v56 }
  0x65   : > { %v911_v16 = vadd.f32 %v885_v12, %v834_v5  ;;  %v944_v17 = vunpack.c.l.bf16 %v1404_v3  ;;  %v960_v18 = vmul.f32 %v1754_v31, %v941_v8  ;;  %v987_v19 = vunpack.c.l.bf16 %v1416_v4  ;;  %v1382_v3 = vld [vmem:[%s1705_s18 + $0xc0] ss:$8 sps:$4 sm:$0xff]  }
  0x66   : > { %v888_v20 = vsel %vm703_vm1, %v886_v7, %v887_v13  ;;  %v961_v21 = vmul.f32 %v1754_v31, %v943_v14  ;;  %v988_v22 = vunpack.c.h.bf16 %v1416_v4  ;;  %v1023_v23 = vmul.f32 %v1760_v44, %v941_v8  ;;  %v1383_v8 = vld [vmem:[%s1705_s18 + $0xc4] sm:$0x1] }
  0x67   : > { %v912_v25 = vadd.f32 %v888_v20, %v835_v10  ;;  %v968_v26 = vadd.f32 %v960_v18, %v911_v16  ;;  %v1000_v27 = vmul.f32 %v1767_v49, %v987_v19  ;;  %v1024_v28 = vmul.f32 %v1760_v44, %v942_v9 }
  0x68   : > { %v1001_v30 = vmul.f32 %v1767_v49, %v988_v22  ;;  %v1025_v32 = vmul.f32 %v1760_v44, %v943_v14  ;;  %v1026_v33 = vmul.f32 %v1760_v44, %v944_v17  ;;  %v1057_v34 = vrot.slane %v1023_v23, 1  ;;  %v1385_v14 = vld [vmem:[%s1705_s18 + $0xcc] sm:$0x1] }
  0x69   : > { %v969_v36 = vadd.f32 %v961_v21, %v912_v25  ;;  %v1008_v37 = vadd.f32 %v1000_v27, %v968_v26  ;;  %v1058_v41 = vrot.slane %v1024_v28, 1  ;;  %v609_v42 = vunpack.c.l.bf16 %v593_v24 }
  0x6a   : > { %v1060_v45 = vrot.slane %v1025_v32, 1  ;;  %v1061_v46 = vrot.slane %v1026_v33, 1  ;;  %v610_v47 = vunpack.c.l.bf16 %v594_v29  ;;  %v611_v48 = vunpack.c.h.bf16 %v593_v24 }
  0x6b   : > { %v1009_v50 = vadd.f32 %v1001_v30, %v969_v36  ;;  %v1059_v51 = vsel %vm703_vm1, %v1057_v34, %v1058_v41  ;;  %v612_v52 = vunpack.c.l.bf16 %v596_v35  ;;  %v624_v53 = vmul.f32 %v1693_v38, %v609_v42  ;;  %v1409_v36 = vld [vmem:[%s1705_s18 + $0x38] ss:$8 sps:$4 sm:$0xff]  }
  0x6c   : > { %v1062_v54 = vsel %vm703_vm1, %v1060_v45, %v1061_v46  ;;  %v1085_v55 = vadd.f32 %v1059_v51, %v1008_v37  ;;  %v625_v56 = vmul.f32 %v1693_v38, %v611_v48  ;;  %v643_v57 = vunpack.c.l.bf16 %v1366_v43  ;;  %v1410_v37 = vld [vmem:[%s1705_s18 + $0x3c] sm:$0x1]  ;;  %v1412_v46 = vld [vmem:[%s1705_s18 + $0x44] sm:$0x1]  ;;  %v1420_v51 = vld [vmem:[%s1705_s18 + $0x80] ss:$8 sps:$4 sm:$0xff]  }
  0x6d   : > { %v1086_v58 = vadd.f32 %v1062_v54, %v1009_v50  ;;  %v644_v59 = vunpack.c.h.bf16 %v1366_v43  ;;  %v683_v60 = vmul.f32 %v1703_v40, %v609_v42  ;;  %v684_v61 = vmul.f32 %v1703_v40, %v610_v47 }
  0x6e   : > { %v1100_v62 = vadd.f32 %v1785_v15, %v1085_v55  ;;  %v656_v63 = vmul.f32 %v1698_v39, %v643_v57  ;;  %v685_v1 = vmul.f32 %v1703_v40, %v611_v48  ;;  %v686_v2 = vmul.f32 %v1703_v40, %v612_v52  ;;  %v1393_v40 = vld [vmem:[%s1705_s18 + $0x108] ss:$8 sps:$4 sm:$0xff]  }
  0x6f   : > { %v1101_v38 = vadd.f32 %v1785_v15, %v1086_v58  ;;  %v657_v4 = vmul.f32 %v1698_v39, %v644_v59  ;;  %v722_v5 = vrot.slane %v683_v60, 1  ;;  %v723_v7 = vrot.slane %v684_v61, 1 }
  0x70   : > { %v1108_v9 = vmax.f32 %v1100_v62, 0.0  ;;  %v664_v10 = vadd.f32 %v656_v63, %v624_v53  ;;  %v725_v12 = vrot.slane %v685_v1, 1  ;;  %v726_v13 = vrot.slane %v686_v2, 1 }
  0x71   : > { %v1109_v16 = vmax.f32 %v1101_v38, 0.0  ;;  %v665_v17 = vadd.f32 %v657_v4, %v625_v56  ;;  %v724_v18 = vsel %vm703_vm1, %v722_v5, %v723_v7  ;;  %v775_v19 = vunpack.c.l.bf16 %v1382_v3 }
  0x72   : > { %v1116_v20 = vmin.f32 %v1108_v9, 6.0  ;;  %v727_v21 = vsel %vm703_vm1, %v725_v12, %v726_v13  ;;  %v742_v39 = vadd.f32 %v724_v18, %v664_v10  ;;  %v776_v22 = vunpack.c.l.bf16 %v1383_v8 }
  0x73   : > { %v1117_v23 = vmin.f32 %v1109_v16, 6.0  ;;  %v743_v24 = vadd.f32 %v727_v21, %v665_v17  ;;  %v777_v25 = vunpack.c.h.bf16 %v1382_v3  ;;  %v778_v26 = vunpack.c.l.bf16 %v1385_v14 }
  0x74   : > { %v790_v27 = vmul.f32 %v1725_v0, %v775_v19  ;;  %v817_v28 = vunpack.c.l.bf16 %v1393_v40  ;;  %v818_v29 = vunpack.c.h.bf16 %v1393_v40  ;;  %v857_v30 = vmul.f32 %v1731_v6, %v775_v19 }
  0x75   : > { %v1123_v32 = vpack.c.bf16 %v1117_v23, %v1116_v20  ;;  %v791_v33 = vmul.f32 %v1725_v0, %v777_v25  ;;  %v858_v34 = vmul.f32 %v1731_v6, %v776_v22  ;;  %v859_v35 = vmul.f32 %v1731_v6, %v777_v25 }
  0x76   : > { %v798_v41 = vadd.f32 %v790_v27, %v742_v39  ;;  %v830_v42 = vmul.f32 %v1736_v11, %v817_v28  ;;  %v831_v43 = vmul.f32 %v1736_v11, %v818_v29  ;;  %v860_v45 = vmul.f32 %v1731_v6, %v778_v26 }
  0x77   : > { %1441 = vmatmul.mubr.msk.bf16.vlgmr.msra.gmra.mxu0 %vm1134_vm2, %v1123_v32  ;;  %v799_v47 = vadd.f32 %v791_v33, %v743_v24  ;;  %v895_v48 = vrot.slane %v857_v30, 1  ;;  %v896_v50 = vrot.slane %v858_v34, 1  ;;  %v898_v0 = vrot.slane %v859_v35, 1  ;;  %v1425_v24 = vld [vmem:[%s1967_s4] ss:$0 sm:$0xff] }
  0x78   : > { %v838_v52 = vadd.f32 %v830_v42, %v798_v41  ;;  %v899_v53 = vrot.slane %v860_v45, 1  ;;  %v949_v54 = vunpack.c.l.bf16 %v1409_v36  ;;  %v950_v55 = vunpack.c.l.bf16 %v1410_v37 }
  0x79   : > { %v839_v56 = vadd.f32 %v831_v43, %v799_v47  ;;  %v897_v57 = vsel %vm703_vm1, %v895_v48, %v896_v50  ;;  %v951_v58 = vunpack.c.h.bf16 %v1409_v36  ;;  %v952_v59 = vunpack.c.l.bf16 %v1412_v46 }
  0x7a   : > { %v900_v11 = vsel %vm703_vm1, %v898_v0, %v899_v53  ;;  %v915_v6 = vadd.f32 %v897_v57, %v838_v52  ;;  %v964_v60 = vmul.f32 %v1754_v31, %v949_v54  ;;  %v991_v61 = vunpack.c.l.bf16 %v1420_v51 }
  0x7b   : > { %v916_v62 = vadd.f32 %v900_v11, %v839_v56  ;;  %v965_v63 = vmul.f32 %v1754_v31, %v951_v58  ;;  %v992_v1 = vunpack.c.h.bf16 %v1420_v51  ;;  %v1031_v2 = vmul.f32 %v1760_v44, %v949_v54 }
  0x7c   : > { %v972_v3 = vadd.f32 %v964_v60, %v915_v6  ;;  %v1004_v38 = vmul.f32 %v1767_v49, %v991_v61  ;;  %v1032_v4 = vmul.f32 %v1760_v44, %v950_v55  ;;  %v1033_v5 = vmul.f32 %v1760_v44, %v951_v58 }
  0x7d   : > { %v973_v7 = vadd.f32 %v965_v63, %v916_v62  ;;  %v1005_v8 = vmul.f32 %v1767_v49, %v992_v1  ;;  %v1034_v9 = vmul.f32 %v1760_v44, %v952_v59  ;;  %v1069_v10 = vrot.slane %v1031_v2, 1 }
  0x7e   : > { %v1012_v12 = vadd.f32 %v1004_v38, %v972_v3  ;;  %v1070_v13 = vrot.slane %v1032_v4, 1  ;;  %v1072_v31 = vrot.slane %v1033_v5, 1  ;;  %vm1232_vm3 = vcmask 64512  }
  0x7f   : > { %v1013_v14 = vadd.f32 %v1005_v8, %v973_v7  ;;  %v1073_v16 = vrot.slane %v1034_v9, 1 }
  0x80   : > { %v1071_v17 = vsel %vm703_vm1, %v1069_v10, %v1070_v13 }
  0x81   : > { %v1074_v18 = vsel %vm703_vm1, %v1072_v31, %v1073_v16  ;;  %v1089_v19 = vadd.f32 %v1071_v17, %v1012_v12 }
  0x82   : > { %v1090_v40 = vadd.f32 %v1074_v18, %v1013_v14 }
  0x83   : > { %v1104_v20 = vadd.f32 %v1785_v15, %v1089_v19 }
  0x84   : > { %v1105_v49 = vadd.f32 %v1785_v15, %v1090_v40 }
  0x85   : > { %v1112_v21 = vmax.f32 %v1104_v20, 0.0 }
  0x86   : > { %v1113_v44 = vmax.f32 %v1105_v49, 0.0 }
  0x87   : > { %v1120_v39 = vmin.f32 %v1112_v21, 6.0 }
  0x88   : > { %v1121_v22 = vmin.f32 %v1113_v44, 6.0 }
  0x8a   : > { %v1125_v23 = vpack.c.bf16 %v1121_v22, %v1120_v39 }
  0x8c   : > { %1445 = vmatmul.mubr.msk.bf16.vlgmr.msra.gmra.mxu1 %vm1134_vm2, %v1125_v23 }
 0x137   : > { %v1442_v25 = vpop.f32.mrf.mxu0 }
 0x138   : > { %v1194_v26 = vadd.f32 %v1442_v25, %v1425_v24 }
 0x139   : > { %v1185_v27 = vpop.f32.mrf.mxu0 }
 0x13a   : > { %v1218_v28 = vmax.f32 %v1194_v26, 0.0  ;;  %v1186_v29 = vadd.f32 %v1425_v24, %v1185_v27 }
 0x13b   : > { %v1443_v15 = vpop.f32.mrf.mxu0 }
 0x13c   : > { %v1226_v30 = vmin.f32 %v1218_v28, 6.0  ;;  %v1216_v32 = vmax.f32 %v1186_v29, 0.0  ;;  %v1197_v33 = vadd.f32 %v1443_v15, %v1425_v24 }
 0x13d   : > { %v1188_v34 = vpop.f32.mrf.mxu0 }
 0x13e   : > { %1235 = vst.msk [vmem:[%s1930_s25 + $0x10] sm:$0xff] %vm1232_vm3, %v1226_v30  ;;  %v1224_v35 = vmin.f32 %v1216_v32, 6.0  ;;  %v1219_v36 = vmax.f32 %v1197_v33, 0.0  ;;  %v1189_v37 = vadd.f32 %v1425_v24, %v1188_v34 }
 0x140   : > { %1233 = vst.msk [vmem:[%s1930_s25] sm:$0xff] %vm1232_vm3, %v1224_v35  ;;  %v1227_v41 = vmin.f32 %v1219_v36, 6.0  ;;  %v1217_v42 = vmax.f32 %v1189_v37, 0.0 }
 0x142   : > { %1236 = vst.msk [vmem:[%s1930_s25 + $0x18] sm:$0xff] %vm1232_vm3, %v1227_v41  ;;  %v1225_v43 = vmin.f32 %v1217_v42, 6.0 }
 0x144   : > { %1234 = vst.msk [vmem:[%s1930_s25 + $0x8] sm:$0xff] %vm1232_vm3, %v1225_v43 }
 0x14c   : > { %v1446_v45 = vpop.f32.mrf.mxu1 }
 0x14d   : > { %v1210_v46 = vadd.f32 %v1446_v45, %v1425_v24 }
 0x14e   : > { %v1201_v47 = vpop.f32.mrf.mxu1 }
 0x14f   : > { %v1222_v48 = vmax.f32 %v1210_v46, 0.0  ;;  %v1202_v50 = vadd.f32 %v1425_v24, %v1201_v47 }
 0x150   : > { %v1447_v0 = vpop.f32.mrf.mxu1 }
 0x151   : > { %v1230_v51 = vmin.f32 %v1222_v48, 6.0  ;;  %v1220_v52 = vmax.f32 %v1202_v50, 0.0  ;;  %v1213_v53 = vadd.f32 %v1447_v0, %v1425_v24 }
 0x152   : > { %v1204_v54 = vpop.f32.mrf.mxu1 }
 0x153   : > { %1239 = vst.msk [vmem:[%s1930_s25 + $0x30] sm:$0xff] %vm1232_vm3, %v1230_v51  ;;  %v1228_v55 = vmin.f32 %v1220_v52, 6.0  ;;  %v1223_v56 = vmax.f32 %v1213_v53, 0.0  ;;  %v1205_v57 = vadd.f32 %v1425_v24, %v1204_v54 }
 0x155   : > { %1237 = vst.msk [vmem:[%s1930_s25 + $0x20] sm:$0xff] %vm1232_vm3, %v1228_v55  ;;  %v1231_v58 = vmin.f32 %v1223_v56, 6.0  ;;  %v1221_v59 = vmax.f32 %v1205_v57, 0.0 }
 0x157   : > { %1240 = vst.msk [vmem:[%s1930_s25 + $0x38] sm:$0xff] %vm1232_vm3, %v1231_v58  ;;  %v1229_v11 = vmin.f32 %v1221_v59, 6.0 }
 0x159   : > { %1238 = vst.msk [vmem:[%s1930_s25 + $0x28] sm:$0xff] %vm1232_vm3, %v1229_v11 }
 0x15a PF: > { %s15_s22 = sadd.s32 1, %s1533_s22   ;;  %s1969_s18 = smov %s1521_s19 }
 0x15b   : > { %p12_p10 = scmp.ge.s32.totalorder %s15_s22, 4   ;;  %s1970_s19 = smov %s1600_s26 }
 0x15c   : > { %s1971_s20 = smov %s1529_s21  ;;  %s1972_s21 = smov %s1974_s23 }
 0x15d   :  { %14 = sbr.rel (!%p12_p10) target bundleno = 3 (0x3), region = 122 }

// kernel: tpu_custom_call.1
= control target key start
LH: loop header
LB: loop body
LE: loop exit
PB: predicated region body
PF: predicated region fallthrough
CT: control target
= control target key end

     0   :  { %s1565_s18 = smov 0   ;;  %s1567_s19 = smov 0   ;;  %s1963_s0 = inlined_call_operand.vmem [shape: bf16[2,2,2,9,9,4], index: 0, kind: input, shape index: {}]   ;;  %s1964_s1 = inlined_call_operand.vmem [shape: f32[9,4], index: 1, kind: input, shape index: {}]   ;;  %s1965_s2 = inlined_call_operand.vmem [shape: f32[1,4], index: 2, kind: input, shape index: {}]   ;;  %s1966_s3 = inlined_call_operand.vmem [shape: bf16[4,8], index: 3, kind: input, shape index: {}]   ;;  %s1967_s4 = inlined_call_operand.vmem [shape: f32[1,8], index: 4, kind: input, shape index: {}]   ;;  %s1968_s5 = inlined_call_operand.vmem [shape: f32[2,64,8], index: 5, kind: output, shape index: {}]  }
   0x1   :  { %s1569_s20 = smov 0   ;;  %s1571_s21 = smov 0  }
   0x2   :  { %s1573_s22 = smov 0  }
   0x3 LB: > { %s27_s23 = sadd.s32 1, %s1529_s21  ;;  %p41_p1 = scmp.ne.s32.totalorder %s1521_s19, %s1517_s18  ;;  %s1533_s22 = sphi %s1573_s22, %s15_s22   ;;  %s1529_s21 = sphi %s1571_s21, %s1972_s21   ;;  %s1525_s20 = sphi %s1569_s20, %s1971_s20   ;;  %s1521_s19 = sphi %s1567_s19, %s1970_s19   ;;  %s1517_s18 = sphi %s1565_s18, %s1969_s18  }
   0x4   : > { %p29_p0 = scmp.ge.s32.totalorder %s27_s23, 2  ;;  %p42_p2 = scmp.eq.s32.totalorder %s1533_s22, 0 }
   0x5   : > { %s34_s25 = sadd.s32 1, %s1521_s19  ;;  %p1354_p5 = scmp.ge.s32.totalorder %s1533_s22, 2 }
   0x6   : > { %s1974_s23 = smov (%p29_p0, %s27_s23), 0  ;;  %p43_p3 = por %p42_p2, %p41_p1 }
   0x7   : > { %s31_s24 = ssub.s32 %s1529_s21, %s1974_s23  ;;  %191 = sbr.rel (%p1354_p5) target bundleno = 35 (0x23), region = 32 }
   0x8   : > { %p32_p4 = scmp.eq.s32.totalorder %s31_s24, 0 }
   0xa   : > { %s1600_s26 = scalar_select %p32_p4, %s1521_s19, %s34_s25  }
   0xc   : > { %194 = sbr.rel (!%p43_p3) target bundleno = 35 (0x23), region = 36  ;;  %s196_s27 = sand.u32 (%p43_p3), 1, %s1521_s19  }
   0xd   : > { %s1453_s28 = smul.u32 (%p43_p3), 72, %s1529_s21 }
   0xe   : > { %s1452_s29 = smul.u32 (%p43_p3), 288, %s196_s27 }
   0xf   : > { %s1608_s7 = scalar_lea.vmem (%p43_p3), %s1963_s0, %s1453_s28 }
  0x10   : > { %v218_v0 = vld [vmem:[%s1608_s7] sm:$0xff] (%p43_p3)   ;;  %v222_v1 = vld [vmem:[%s1608_s7 + $0x8] sm:$0xff] (%p43_p3)   ;;  %v226_v2 = vld [vmem:[%s1608_s7 + $0x10] sm:$0xff] (%p43_p3)   ;;  %s1613_s8 = scalar_lea.vmem (%p43_p3), [#allocation2], %s1452_s29 }
  0x11   : > { %219 = vst [vmem:[%s1613_s8] sm:$0xff] %v218_v0   ;;  %223 = vst [vmem:[%s1613_s8 + $0x8] sm:$0xff] %v222_v1   ;;  %v230_v3 = vld [vmem:[%s1608_s7 + $0x18] sm:$0xff]   ;;  %v234_v4 = vld [vmem:[%s1608_s7 + $0x20] sm:$0xff]  }
  0x12   : > { %227 = vst [vmem:[%s1613_s8 + $0x10] sm:$0xff] %v226_v2   ;;  %v238_v5 = vld [vmem:[%s1608_s7 + $0x28] sm:$0xff]   ;;  %231 = vst [vmem:[%s1613_s8 + $0x18] sm:$0xff] %v230_v3   ;;  %v242_v6 = vld [vmem:[%s1608_s7 + $0x30] sm:$0xff]  }
  0x13   : > { %235 = vst [vmem:[%s1613_s8 + $0x20] sm:$0xff] %v234_v4   ;;  %239 = vst [vmem:[%s1613_s8 + $0x28] sm:$0xff] %v238_v5   ;;  %v246_v7 = vld [vmem:[%s1608_s7 + $0x38] sm:$0xff]   ;;  %v250_v8 = vld [vmem:[%s1608_s7 + $0x40] sm:$0xff]  }
  0x14   : > { %243 = vst [vmem:[%s1613_s8 + $0x30] sm:$0xff] %v242_v6   ;;  %247 = vst [vmem:[%s1613_s8 + $0x38] sm:$0xff] %v246_v7   ;;  %v254_v9 = vld [vmem:[%s1608_s7 + $0x90] sm:$0xff]   ;;  %v258_v10 = vld [vmem:[%s1608_s7 + $0x98] sm:$0xff]  }
  0x15   : > { %251 = vst [vmem:[%s1613_s8 + $0x40] sm:$0xff] %v250_v8   ;;  %v262_v11 = vld [vmem:[%s1608_s7 + $0xa0] sm:$0xff]   ;;  %255 = vst [vmem:[%s1613_s8 + $0x48] sm:$0xff] %v254_v9   ;;  %v266_v12 = vld [vmem:[%s1608_s7 + $0xa8] sm:$0xff]  }
  0x16   : > { %259 = vst [vmem:[%s1613_s8 + $0x50] sm:$0xff] %v258_v10   ;;  %263 = vst [vmem:[%s1613_s8 + $0x58] sm:$0xff] %v262_v11   ;;  %v270_v13 = vld [vmem:[%s1608_s7 + $0xb0] sm:$0xff]   ;;  %v274_v14 = vld [vmem:[%s1608_s7 + $0xb8] sm:$0xff]  }
  0x17   : > { %267 = vst [vmem:[%s1613_s8 + $0x60] sm:$0xff] %v266_v12   ;;  %271 = vst [vmem:[%s1613_s8 + $0x68] sm:$0xff] %v270_v13   ;;  %v278_v15 = vld [vmem:[%s1608_s7 + $0xc0] sm:$0xff]   ;;  %v282_v16 = vld [vmem:[%s1608_s7 + $0xc8] sm:$0xff]  }
  0x18   : > { %275 = vst [vmem:[%s1613_s8 + $0x70] sm:$0xff] %v274_v14   ;;  %v286_v17 = vld [vmem:[%s1608_s7 + $0xd0] sm:$0xff]   ;;  %279 = vst [vmem:[%s1613_s8 + $0x78] sm:$0xff] %v278_v15   ;;  %v290_v18 = vld [vmem:[%s1608_s7 + $0x120] sm:$0xff]  }
  0x19   : > { %283 = vst [vmem:[%s1613_s8 + $0x80] sm:$0xff] %v282_v16   ;;  %287 = vst [vmem:[%s1613_s8 + $0x88] sm:$0xff] %v286_v17   ;;  %v294_v19 = vld [vmem:[%s1608_s7 + $0x128] sm:$0xff]   ;;  %v298_v20 = vld [vmem:[%s1608_s7 + $0x130] sm:$0xff]  }
  0x1a   : > { %291 = vst [vmem:[%s1613_s8 + $0x90] sm:$0xff] %v290_v18   ;;  %295 = vst [vmem:[%s1613_s8 + $0x98] sm:$0xff] %v294_v19   ;;  %v302_v21 = vld [vmem:[%s1608_s7 + $0x138] sm:$0xff]   ;;  %v306_v22 = vld [vmem:[%s1608_s7 + $0x140] sm:$0xff]  }
  0x1b   : > { %299 = vst [vmem:[%s1613_s8 + $0xa0] sm:$0xff] %v298_v20   ;;  %v310_v23 = vld [vmem:[%s1608_s7 + $0x148] sm:$0xff]   ;;  %303 = vst [vmem:[%s1613_s8 + $0xa8] sm:$0xff] %v302_v21   ;;  %v314_v24 = vld [vmem:[%s1608_s7 + $0x150] sm:$0xff]  }
  0x1c   : > { %307 = vst [vmem:[%s1613_s8 + $0xb0] sm:$0xff] %v306_v22   ;;  %311 = vst [vmem:[%s1613_s8 + $0xb8] sm:$0xff] %v310_v23   ;;  %v318_v25 = vld [vmem:[%s1608_s7 + $0x158] sm:$0xff]   ;;  %v322_v26 = vld [vmem:[%s1608_s7 + $0x160] sm:$0xff]  }
  0x1d   : > { %315 = vst [vmem:[%s1613_s8 + $0xc0] sm:$0xff] %v314_v24   ;;  %319 = vst [vmem:[%s1613_s8 + $0xc8] sm:$0xff] %v318_v25   ;;  %v326_v27 = vld [vmem:[%s1608_s7 + $0x1b0] sm:$0xff]   ;;  %v330_v28 = vld [vmem:[%s1608_s7 + $0x1b8] sm:$0xff]  }
  0x1e   : > { %323 = vst [vmem:[%s1613_s8 + $0xd0] sm:$0xff] %v322_v26   ;;  %v334_v29 = vld [vmem:[%s1608_s7 + $0x1c0] sm:$0xff]   ;;  %327 = vst [vmem:[%s1613_s8 + $0xd8] sm:$0xff] %v326_v27   ;;  %v338_v30 = vld [vmem:[%s1608_s7 + $0x1c8] sm:$0xff]  }
  0x1f   : > { %331 = vst [vmem:[%s1613_s8 + $0xe0] sm:$0xff] %v330_v28   ;;  %335 = vst [vmem:[%s1613_s8 + $0xe8] sm:$0xff] %v334_v29   ;;  %v342_v31 = vld [vmem:[%s1608_s7 + $0x1d0] sm:$0xff]   ;;  %v346_v32 = vld [vmem:[%s1608_s7 + $0x1d8] sm:$0xff]  }
  0x20   : > { %339 = vst [vmem:[%s1613_s8 + $0xf0] sm:$0xff] %v338_v30   ;;  %343 = vst [vmem:[%s1613_s8 + $0xf8] sm:$0xff] %v342_v31   ;;  %v350_v33 = vld [vmem:[%s1608_s7 + $0x1e0] sm:$0xff]   ;;  %v354_v34 = vld [vmem:[%s1608_s7 + $0x1e8] sm:$0xff]  }
  0x21   : > { %347 = vst [vmem:[%s1613_s8 + $0x100] sm:$0xff] %v346_v32   ;;  %v358_v35 = vld [vmem:[%s1608_s7 + $0x1f0] sm:$0xff]   ;;  %351 = vst [vmem:[%s1613_s8 + $0x108] sm:$0xff] %v350_v33  }
  0x22   : > { %355 = vst [vmem:[%s1613_s8 + $0x110] sm:$0xff] %v354_v34   ;;  %359 = vst [vmem:[%s1613_s8 + $0x118] sm:$0xff] %v358_v35  }
  0x23 PF: > { %p1356_p6 = scmp.ge.s32.totalorder %s1533_s22, 1  ;;  %p528_p7 = scmp.lt.s32.totalorder %s1533_s22, 3 }
  0x25   : > { %p529_p8 = pnand %p1356_p6, %p528_p7 }
  0x26   : > { %s535_s11 = sand.u32 (!%p529_p8), 1, %s1517_s18   ;;  %p567_p9 = scmp.lt.s32.totalorder (!%p529_p8), %s1525_s20, 1 }
  0x27   : > { %532 = sbr.rel (%p529_p8) target bundleno = 346 (0x15a), region = 77 }
  0x28   : > { %s1454_s12 = smul.u32 (!%p529_p8), 288, %s535_s11 }
  0x2a   : > { %s1705_s18 = scalar_lea.vmem (!%p529_p8), [#allocation2], %s1454_s12 }
  0x2c   : > { %v1126_v36 = vld [vmem:[%s1966_s3] sm:$0x3]  ;;  %vm1147_vm0 = vcmask 1041408   ;;  %v1703_v40 = vld [vmem:[%s1964_s1 + $0x2] ss:$0 sm:$0xff]  ;;  %vm703_vm1 = vcmask 1046528  }
  0x2d   : > { %1450 = vmatprep.subr.msk.bf16.mxu0 %vm1147_vm0, %v1126_v36  ;;  %1451 = vmatprep.subr.msk.bf16.mxu1 %vm1147_vm0, %v1126_v36  ;;  %v1149_v37 = vsel %vm1147_vm0, %v1126_v36, 0  ;;  %v1693_v38 = vld [vmem:[%s1964_s1] ss:$0 sm:$0xff]  ;;  %v1698_v39 = vld [vmem:[%s1964_s1 + $0x1] ss:$0 sm:$0xff]  ;;  %vm1134_vm2 = vcmask 31744  }
  0x2e   : > { %1439 = vmatpush3.bf16.msra.mxu0 %v1149_v37  ;;  %1449 = vmatpush3.bf16.msra.mxu1 %v1149_v37  ;;  %v581_v41 = vld [vmem:[%s1705_s18] ss:$8 sps:$4 sm:$0xff]   ;;  %v582_v42 = vld [vmem:[%s1705_s18 + $0x4] sm:$0x1]  ;;  %v584_v43 = vld [vmem:[%s1705_s18 + $0xc] sm:$0x1] }
  0x2f   : > { %v597_v44 = vunpack.c.l.bf16 %v581_v41  ;;  %v598_v45 = vunpack.c.l.bf16 %v582_v42  ;;  %v599_v46 = vunpack.c.h.bf16 %v581_v41  ;;  %v600_v47 = vunpack.c.l.bf16 %v584_v43  ;;  %v1360_v48 = vld [vmem:[%s1705_s18 + $0x48] ss:$8 sps:$4 sm:$0xff]   ;;  %v1371_v50 = vld [vmem:[%s1705_s18 + $0x94] sm:$0x1]  ;;  %v1373_v53 = vld [vmem:[%s1705_s18 + $0x9c] sm:$0x1] }
  0x30   : > { %v1370_v49 = vld [vmem:[%s1705_s18 + $0x90] ss:$8 sps:$4 sm:$0xff]   ;;  %v637_v51 = vunpack.c.l.bf16 %v1360_v48  ;;  %v638_v52 = vunpack.c.h.bf16 %v1360_v48  ;;  %v764_v55 = vunpack.c.l.bf16 %v1371_v50  ;;  %v1725_v0 = vld [vmem:[%s1964_s1 + $0x3] ss:$0 sm:$0xff]  ;;  %v766_v5 = vunpack.c.l.bf16 %v1373_v53  ;;  %v1731_v6 = vld [vmem:[%s1964_s1 + $0x5] ss:$0 sm:$0xff] }
  0x31   : > { %v763_v54 = vunpack.c.l.bf16 %v1370_v49  ;;  %v618_v56 = vmul.f32 %v1693_v38, %v597_v44  ;;  %v619_v57 = vmul.f32 %v1693_v38, %v599_v46  ;;  %v671_v58 = vmul.f32 %v1703_v40, %v597_v44  ;;  %v1387_v1 = vld [vmem:[%s1705_s18 + $0xd8] ss:$8 sps:$4 sm:$0xff]   ;;  %v1736_v11 = vld [vmem:[%s1964_s1 + $0x4] ss:$0 sm:$0xff]  ;;  %v1397_v20 = vld [vmem:[%s1705_s18 + $0x8] ss:$8 sps:$4 sm:$0xff]  }
  0x32   : > { %v672_v59 = vmul.f32 %v1703_v40, %v598_v45  ;;  %v650_v60 = vmul.f32 %v1698_v39, %v637_v51  ;;  %v651_v61 = vmul.f32 %v1698_v39, %v638_v52  ;;  %v673_v62 = vmul.f32 %v1703_v40, %v599_v46  ;;  %v1398_v25 = vld [vmem:[%s1705_s18 + $0xc] sm:$0x1]  ;;  %v1400_v30 = vld [vmem:[%s1705_s18 + $0x14] sm:$0x1]  ;;  %v1754_v31 = vld [vmem:[%s1964_s1 + $0x6] ss:$0 sm:$0xff] }
  0x33   : > { %v674_v63 = vmul.f32 %v1703_v40, %v600_v47  ;;  %v704_v2 = vrot.slane %v671_v58, 1  ;;  %v765_v4 = vunpack.c.h.bf16 %v1370_v49  ;;  %v784_v13 = vmul.f32 %v1725_v0, %v763_v54  ;;  %v1414_v36 = vld [vmem:[%s1705_s18 + $0x50] ss:$8 sps:$4 sm:$0xff]   ;;  %v1760_v44 = vld [vmem:[%s1964_s1 + $0x8] ss:$0 sm:$0xff]  ;;  %s1976_s20 = smov (!%p567_p9, %s1525_s20), 1 }
  0x34   : > { %v705_v3 = vrot.slane %v672_v59, 1  ;;  %v658_v7 = vadd.f32 %v650_v60, %v618_v56  ;;  %v659_v8 = vadd.f32 %v651_v61, %v619_v57  ;;  %v707_v9 = vrot.slane %v673_v62, 1  ;;  %v1767_v49 = vld [vmem:[%s1964_s1 + $0x7] ss:$0 sm:$0xff]  ;;  %v589_v58 = vld [vmem:[%s1705_s18 + $0x20] ss:$8 sps:$4 sm:$0xff]  }
  0x35   : > { %v708_v10 = vrot.slane %v674_v63, 1  ;;  %v785_v14 = vmul.f32 %v1725_v0, %v765_v4  ;;  %v811_v15 = vunpack.c.l.bf16 %v1387_v1  ;;  %v812_v18 = vunpack.c.h.bf16 %v1387_v1  ;;  %v590_v63 = vld [vmem:[%s1705_s18 + $0x24] sm:$0x1]  ;;  %s1432_s17 = sshll.u32 %s1976_s20, 6 }
  0x36   : > { %v706_v12 = vsel %vm703_vm1, %v704_v2, %v705_v3  ;;  %v845_v19 = vmul.f32 %v1731_v6, %v763_v54  ;;  %v846_v23 = vmul.f32 %v1731_v6, %v764_v55  ;;  %v847_v24 = vmul.f32 %v1731_v6, %v765_v4  ;;  %s1930_s25 = scalar_lea.vmem %s1968_s5, %s1432_s17 }
  0x37   : > { %v709_v16 = vsel %vm703_vm1, %v707_v9, %v708_v10  ;;  %v736_v17 = vadd.f32 %v706_v12, %v658_v7  ;;  %v824_v22 = vmul.f32 %v1736_v11, %v811_v15  ;;  %v825_v27 = vmul.f32 %v1736_v11, %v812_v18  ;;  %v1364_v12 = vld [vmem:[%s1705_s18 + $0x68] ss:$8 sps:$4 sm:$0xff]   ;;  %v1785_v15 = vld [vmem:[%s1965_s2] ss:$0 sm:$0xff] }
  0x38   : > { %v737_v21 = vadd.f32 %v709_v16, %v659_v8  ;;  %v848_v28 = vmul.f32 %v1731_v6, %v766_v5  ;;  %v877_v29 = vrot.slane %v845_v19, 1  ;;  %v878_v33 = vrot.slane %v846_v23, 1  ;;  %v592_v5 = vld [vmem:[%s1705_s18 + $0x2c] sm:$0x1] }
  0x39   : > { %v792_v26 = vadd.f32 %v784_v13, %v736_v17  ;;  %v880_v34 = vrot.slane %v847_v24, 1  ;;  %v937_v35 = vunpack.c.l.bf16 %v1397_v20  ;;  %v938_v42 = vunpack.c.l.bf16 %v1398_v25 }
  0x3a   : > { %v793_v32 = vadd.f32 %v785_v14, %v737_v21  ;;  %v881_v41 = vrot.slane %v848_v28, 1  ;;  %v939_v43 = vunpack.c.h.bf16 %v1397_v20  ;;  %v879_v46 = vsel %vm703_vm1, %v877_v29, %v878_v33 }
  0x3b   : > { %v832_v37 = vadd.f32 %v824_v22, %v792_v26  ;;  %v940_v47 = vunpack.c.l.bf16 %v1400_v30  ;;  %v958_v48 = vmul.f32 %v1754_v31, %v937_v35  ;;  %v985_v53 = vunpack.c.l.bf16 %v1414_v36 }
  0x3c   : > { %v833_v45 = vadd.f32 %v825_v27, %v793_v32  ;;  %v882_v50 = vsel %vm703_vm1, %v880_v34, %v881_v41  ;;  %v959_v52 = vmul.f32 %v1754_v31, %v939_v43  ;;  %v986_v55 = vunpack.c.h.bf16 %v1414_v36  ;;  %v1379_v36 = vld [vmem:[%s1705_s18 + $0xb4] sm:$0x1] }
  0x3d   : > { %v909_v51 = vadd.f32 %v879_v46, %v832_v37  ;;  %v1019_v56 = vmul.f32 %v1760_v44, %v937_v35  ;;  %v1020_v57 = vmul.f32 %v1760_v44, %v938_v42  ;;  %v998_v60 = vmul.f32 %v1767_v49, %v985_v53  ;;  %v1378_v35 = vld [vmem:[%s1705_s18 + $0xb0] ss:$8 sps:$4 sm:$0xff]  }
  0x3e   : > { %v910_v54 = vadd.f32 %v882_v50, %v833_v45  ;;  %v1021_v61 = vmul.f32 %v1760_v44, %v939_v43  ;;  %v1022_v62 = vmul.f32 %v1760_v44, %v940_v47  ;;  %v999_v2 = vmul.f32 %v1767_v49, %v986_v55  ;;  %v1381_v50 = vld [vmem:[%s1705_s18 + $0xbc] sm:$0x1] }
  0x3f   : > { %v966_v59 = vadd.f32 %v958_v48, %v909_v51  ;;  %v1051_v3 = vrot.slane %v1019_v56, 1  ;;  %v1052_v4 = vrot.slane %v1020_v57, 1  ;;  %v605_v10 = vunpack.c.l.bf16 %v589_v58  ;;  %v1391_v51 = vld [vmem:[%s1705_s18 + $0xf8] ss:$8 sps:$4 sm:$0xff]  }
  0x40   : > { %v967_v1 = vadd.f32 %v959_v52, %v910_v54  ;;  %v1054_v8 = vrot.slane %v1021_v61, 1  ;;  %v1055_v9 = vrot.slane %v1022_v62, 1  ;;  %v606_v16 = vunpack.c.l.bf16 %v590_v63 }
  0x41   : > { %v1006_v7 = vadd.f32 %v998_v60, %v966_v59  ;;  %v1053_v14 = vsel %vm703_vm1, %v1051_v3, %v1052_v4  ;;  %v607_v17 = vunpack.c.h.bf16 %v589_v58  ;;  %v608_v20 = vunpack.c.l.bf16 %v592_v5  ;;  %v1405_v5 = vld [vmem:[%s1705_s18 + $0x28] ss:$8 sps:$4 sm:$0xff]  }
  0x42   : > { %v1007_v13 = vadd.f32 %v999_v2, %v967_v1  ;;  %v1056_v18 = vsel %vm703_vm1, %v1054_v8, %v1055_v9  ;;  %v622_v21 = vmul.f32 %v1693_v38, %v605_v10  ;;  %v641_v24 = vunpack.c.l.bf16 %v1364_v12 }
  0x43   : > { %v1083_v19 = vadd.f32 %v1053_v14, %v1006_v7  ;;  %v623_v23 = vmul.f32 %v1693_v38, %v607_v17  ;;  %v642_v25 = vunpack.c.h.bf16 %v1364_v12  ;;  %v679_v27 = vmul.f32 %v1703_v40, %v605_v10  ;;  %v1406_v12 = vld [vmem:[%s1705_s18 + $0x2c] sm:$0x1] }
  0x44   : > { %v1084_v22 = vadd.f32 %v1056_v18, %v1007_v13  ;;  %v680_v28 = vmul.f32 %v1703_v40, %v606_v16  ;;  %v681_v29 = vmul.f32 %v1703_v40, %v607_v17  ;;  %v654_v32 = vmul.f32 %v1698_v39, %v641_v24  ;;  %v1408_v18 = vld [vmem:[%s1705_s18 + $0x34] sm:$0x1] }
  0x45   : > { %v1098_v26 = vadd.f32 %v1785_v15, %v1083_v19  ;;  %v655_v33 = vmul.f32 %v1698_v39, %v642_v25  ;;  %v682_v34 = vmul.f32 %v1703_v40, %v608_v20  ;;  %v716_v41 = vrot.slane %v679_v27, 1  ;;  %v1418_v19 = vld [vmem:[%s1705_s18 + $0x70] ss:$8 sps:$4 sm:$0xff]  }
  0x46   : > { %v1099_v30 = vadd.f32 %v1785_v15, %v1084_v22  ;;  %v717_v42 = vrot.slane %v680_v28, 1  ;;  %v719_v43 = vrot.slane %v681_v29, 1  ;;  %v662_v46 = vadd.f32 %v654_v32, %v622_v21 }
  0x47   : > { %v1106_v37 = vmax.f32 %v1098_v26, 0.0  ;;  %v663_v47 = vadd.f32 %v655_v33, %v623_v23  ;;  %v720_v48 = vrot.slane %v682_v34, 1  ;;  %v771_v54 = vunpack.c.l.bf16 %v1378_v35 }
  0x48   : > { %v1107_v45 = vmax.f32 %v1099_v30, 0.0  ;;  %v718_v53 = vsel %vm703_vm1, %v716_v41, %v717_v42  ;;  %v772_v55 = vunpack.c.l.bf16 %v1379_v36  ;;  %v773_v59 = vunpack.c.h.bf16 %v1378_v35 }
  0x49   : > { %v1114_v52 = vmin.f32 %v1106_v37, 6.0  ;;  %v721_v57 = vsel %vm703_vm1, %v719_v43, %v720_v48  ;;  %v740_v58 = vadd.f32 %v718_v53, %v662_v46  ;;  %v774_v61 = vunpack.c.l.bf16 %v1381_v50  ;;  %v585_v37 = vld [vmem:[%s1705_s18 + $0x10] ss:$8 sps:$4 sm:$0xff]   ;;  %v586_v46 = vld [vmem:[%s1705_s18 + $0x14] sm:$0x1] }
  0x4a   : > { %v1115_v56 = vmin.f32 %v1107_v45, 6.0  ;;  %v741_v60 = vadd.f32 %v721_v57, %v663_v47  ;;  %v788_v62 = vmul.f32 %v1725_v0, %v771_v54  ;;  %v815_v63 = vunpack.c.l.bf16 %v1391_v51  ;;  %v1362_v57 = vld [vmem:[%s1705_s18 + $0x58] ss:$8 sps:$4 sm:$0xff]  }
  0x4b   : > { %v789_v2 = vmul.f32 %v1725_v0, %v773_v59  ;;  %v816_v3 = vunpack.c.h.bf16 %v1391_v51  ;;  %v853_v4 = vmul.f32 %v1731_v6, %v771_v54  ;;  %v854_v9 = vmul.f32 %v1731_v6, %v772_v55 }
  0x4c   : > { %v1122_v1 = vpack.c.bf16 %v1115_v56, %v1114_v52  ;;  %v796_v7 = vadd.f32 %v788_v62, %v740_v58  ;;  %v828_v8 = vmul.f32 %v1736_v11, %v815_v63  ;;  %v855_v10 = vmul.f32 %v1731_v6, %v773_v59  ;;  %v588_v52 = vld [vmem:[%s1705_s18 + $0x1c] sm:$0x1] }
  0x4d   : > { %v797_v13 = vadd.f32 %v789_v2, %v741_v60  ;;  %v829_v14 = vmul.f32 %v1736_v11, %v816_v3  ;;  %v856_v16 = vmul.f32 %v1731_v6, %v774_v61  ;;  %v889_v17 = vrot.slane %v853_v4, 1 }
  0x4e   : > { %1440 = vmatprep.mubr.msk.bf16.mxu0 %vm1134_vm2, %v1122_v1  ;;  %v836_v20 = vadd.f32 %v828_v8, %v796_v7  ;;  %v890_v21 = vrot.slane %v854_v9, 1  ;;  %v892_v22 = vrot.slane %v855_v10, 1  ;;  %v945_v23 = vunpack.c.l.bf16 %v1405_v5 }
  0x4f   : > { %v837_v24 = vadd.f32 %v829_v14, %v797_v13  ;;  %v893_v25 = vrot.slane %v856_v16, 1  ;;  %v946_v26 = vunpack.c.l.bf16 %v1406_v12  ;;  %v947_v27 = vunpack.c.h.bf16 %v1405_v5 }
  0x50   : > { %v891_v28 = vsel %vm703_vm1, %v889_v17, %v890_v21  ;;  %v948_v29 = vunpack.c.l.bf16 %v1408_v18  ;;  %v962_v30 = vmul.f32 %v1754_v31, %v945_v23  ;;  %v989_v32 = vunpack.c.l.bf16 %v1418_v19  ;;  %v1374_v18 = vld [vmem:[%s1705_s18 + $0xa0] ss:$8 sps:$4 sm:$0xff]  }
  0x51   : > { %v894_v33 = vsel %vm703_vm1, %v892_v22, %v893_v25  ;;  %v913_v34 = vadd.f32 %v891_v28, %v836_v20  ;;  %v963_v35 = vmul.f32 %v1754_v31, %v947_v27  ;;  %v990_v36 = vunpack.c.h.bf16 %v1418_v19  ;;  %v1377_v28 = vld [vmem:[%s1705_s18 + $0xac] sm:$0x1] }
  0x52   : > { %v914_v41 = vadd.f32 %v894_v33, %v837_v24  ;;  %v1002_v42 = vmul.f32 %v1767_v49, %v989_v32  ;;  %v1027_v43 = vmul.f32 %v1760_v44, %v945_v23  ;;  %v1028_v45 = vmul.f32 %v1760_v44, %v946_v26  ;;  %v1375_v23 = vld [vmem:[%s1705_s18 + $0xa4] sm:$0x1] }
  0x53   : > { %v970_v47 = vadd.f32 %v962_v30, %v913_v34  ;;  %v1003_v48 = vmul.f32 %v1767_v49, %v990_v36  ;;  %v1029_v50 = vmul.f32 %v1760_v44, %v947_v27  ;;  %v1030_v51 = vmul.f32 %v1760_v44, %v948_v29  ;;  %v1389_v34 = vld [vmem:[%s1705_s18 + $0xe8] ss:$8 sps:$4 sm:$0xff]  }
  0x54   : > { %v971_v53 = vadd.f32 %v963_v35, %v914_v41  ;;  %v1063_v54 = vrot.slane %v1027_v43, 1  ;;  %v1064_v55 = vrot.slane %v1028_v45, 1  ;;  %v601_v56 = vunpack.c.l.bf16 %v585_v37 }
  0x55   : > { %v1010_v58 = vadd.f32 %v1002_v42, %v970_v47  ;;  %v1066_v59 = vrot.slane %v1029_v50, 1  ;;  %v1067_v60 = vrot.slane %v1030_v51, 1  ;;  %v602_v61 = vunpack.c.l.bf16 %v586_v46 }
  0x56   : > { %v1011_v62 = vadd.f32 %v1003_v48, %v971_v53  ;;  %v1065_v63 = vsel %vm703_vm1, %v1063_v54, %v1064_v55  ;;  %v603_v1 = vunpack.c.h.bf16 %v585_v37  ;;  %v604_v2 = vunpack.c.l.bf16 %v588_v52 }
  0x57   : > { %v1068_v3 = vsel %vm703_vm1, %v1066_v59, %v1067_v60  ;;  %v1087_v4 = vadd.f32 %v1065_v63, %v1010_v58  ;;  %v620_v5 = vmul.f32 %v1693_v38, %v601_v56  ;;  %v639_v7 = vunpack.c.l.bf16 %v1362_v57 }
  0x58   : > { %v1088_v8 = vadd.f32 %v1068_v3, %v1011_v62  ;;  %v621_v9 = vmul.f32 %v1693_v38, %v603_v1  ;;  %v640_v10 = vunpack.c.h.bf16 %v1362_v57  ;;  %v675_v12 = vmul.f32 %v1703_v40, %v601_v56  ;;  %v1401_v56 = vld [vmem:[%s1705_s18 + $0x18] ss:$8 sps:$4 sm:$0xff]   ;;  %v1402_v57 = vld [vmem:[%s1705_s18 + $0x1c] sm:$0x1]  ;;  %v1404_v3 = vld [vmem:[%s1705_s18 + $0x24] sm:$0x1] }
  0x59   : > { %v1102_v13 = vadd.f32 %v1785_v15, %v1087_v4  ;;  %v652_v14 = vmul.f32 %v1698_v39, %v639_v7  ;;  %v676_v16 = vmul.f32 %v1703_v40, %v602_v61  ;;  %v677_v17 = vmul.f32 %v1703_v40, %v603_v1  ;;  %v1416_v4 = vld [vmem:[%s1705_s18 + $0x60] ss:$8 sps:$4 sm:$0xff]  }
  0x5a   : > { %v1103_v19 = vadd.f32 %v1785_v15, %v1088_v8  ;;  %v653_v20 = vmul.f32 %v1698_v39, %v640_v10  ;;  %v678_v21 = vmul.f32 %v1703_v40, %v604_v2  ;;  %v710_v22 = vrot.slane %v675_v12, 1 }
  0x5b   : > { %v1110_v24 = vmax.f32 %v1102_v13, 0.0  ;;  %v660_v25 = vadd.f32 %v652_v14, %v620_v5  ;;  %v711_v26 = vrot.slane %v676_v16, 1  ;;  %v713_v27 = vrot.slane %v677_v17, 1 }
  0x5c   : > { %v1111_v29 = vmax.f32 %v1103_v19, 0.0  ;;  %v661_v30 = vadd.f32 %v653_v20, %v621_v9  ;;  %v714_v32 = vrot.slane %v678_v21, 1  ;;  %v767_v33 = vunpack.c.l.bf16 %v1374_v18 }
  0x5d   : > { %v1118_v35 = vmin.f32 %v1110_v24, 6.0  ;;  %v712_v36 = vsel %vm703_vm1, %v710_v22, %v711_v26  ;;  %v768_v37 = vunpack.c.l.bf16 %v1375_v23  ;;  %v769_v41 = vunpack.c.h.bf16 %v1374_v18  ;;  %v593_v24 = vld [vmem:[%s1705_s18 + $0x30] ss:$8 sps:$4 sm:$0xff]  }
  0x5e   : > { %v1119_v42 = vmin.f32 %v1111_v29, 6.0  ;;  %v715_v43 = vsel %vm703_vm1, %v713_v27, %v714_v32  ;;  %v738_v45 = vadd.f32 %v712_v36, %v660_v25  ;;  %v770_v46 = vunpack.c.l.bf16 %v1377_v28  ;;  %v594_v29 = vld [vmem:[%s1705_s18 + $0x34] sm:$0x1] }
  0x5f   : > { %v739_v47 = vadd.f32 %v715_v43, %v661_v30  ;;  %v786_v48 = vmul.f32 %v1725_v0, %v767_v33  ;;  %v787_v50 = vmul.f32 %v1725_v0, %v769_v41  ;;  %v813_v51 = vunpack.c.l.bf16 %v1389_v34  ;;  %v1366_v43 = vld [vmem:[%s1705_s18 + $0x78] ss:$8 sps:$4 sm:$0xff]  }
  0x60   : > { %v1124_v52 = vpack.c.bf16 %v1119_v42, %v1118_v35  ;;  %v814_v53 = vunpack.c.h.bf16 %v1389_v34  ;;  %v849_v54 = vmul.f32 %v1731_v6, %v767_v33  ;;  %v850_v55 = vmul.f32 %v1731_v6, %v768_v37  ;;  %v596_v35 = vld [vmem:[%s1705_s18 + $0x3c] sm:$0x1] }
  0x61   : > { %v794_v58 = vadd.f32 %v786_v48, %v738_v45  ;;  %v795_v59 = vadd.f32 %v787_v50, %v739_v47  ;;  %v826_v60 = vmul.f32 %v1736_v11, %v813_v51  ;;  %v851_v61 = vmul.f32 %v1731_v6, %v769_v41 }
  0x62   : > { %1444 = vmatprep.mubr.msk.bf16.mxu1 %vm1134_vm2, %v1124_v52  ;;  %v827_v62 = vmul.f32 %v1736_v11, %v814_v53  ;;  %v852_v63 = vmul.f32 %v1731_v6, %v770_v46  ;;  %v883_v1 = vrot.slane %v849_v54, 1  ;;  %v884_v2 = vrot.slane %v850_v55, 1 }
  0x63   : > { %v834_v5 = vadd.f32 %v826_v60, %v794_v58  ;;  %v886_v7 = vrot.slane %v851_v61, 1  ;;  %v941_v8 = vunpack.c.l.bf16 %v1401_v56  ;;  %v942_v9 = vunpack.c.l.bf16 %v1402_v57 }
  0x64   : > { %v835_v10 = vadd.f32 %v827_v62, %v795_v59  ;;  %v885_v12 = vsel %vm703_vm1, %v883_v1, %v884_v2  ;;  %v887_v13 = vrot.slane %v852_v63, 1  ;;  %v943_v14 = vunpack.c.h.bf16 %v1401_v56 }
  0x65   : > { %v911_v16 = vadd.f32 %v885_v12, %v834_v5  ;;  %v944_v17 = vunpack.c.l.bf16 %v1404_v3  ;;  %v960_v18 = vmul.f32 %v1754_v31, %v941_v8  ;;  %v987_v19 = vunpack.c.l.bf16 %v1416_v4  ;;  %v1382_v3 = vld [vmem:[%s1705_s18 + $0xc0] ss:$8 sps:$4 sm:$0xff]  }
  0x66   : > { %v888_v20 = vsel %vm703_vm1, %v886_v7, %v887_v13  ;;  %v961_v21 = vmul.f32 %v1754_v31, %v943_v14  ;;  %v988_v22 = vunpack.c.h.bf16 %v1416_v4  ;;  %v1023_v23 = vmul.f32 %v1760_v44, %v941_v8  ;;  %v1383_v8 = vld [vmem:[%s1705_s18 + $0xc4] sm:$0x1] }
  0x67   : > { %v912_v25 = vadd.f32 %v888_v20, %v835_v10  ;;  %v968_v26 = vadd.f32 %v960_v18, %v911_v16  ;;  %v1000_v27 = vmul.f32 %v1767_v49, %v987_v19  ;;  %v1024_v28 = vmul.f32 %v1760_v44, %v942_v9 }
  0x68   : > { %v1001_v30 = vmul.f32 %v1767_v49, %v988_v22  ;;  %v1025_v32 = vmul.f32 %v1760_v44, %v943_v14  ;;  %v1026_v33 = vmul.f32 %v1760_v44, %v944_v17  ;;  %v1057_v34 = vrot.slane %v1023_v23, 1  ;;  %v1385_v14 = vld [vmem:[%s1705_s18 + $0xcc] sm:$0x1] }
  0x69   : > { %v969_v36 = vadd.f32 %v961_v21, %v912_v25  ;;  %v1008_v37 = vadd.f32 %v1000_v27, %v968_v26  ;;  %v1058_v41 = vrot.slane %v1024_v28, 1  ;;  %v609_v42 = vunpack.c.l.bf16 %v593_v24 }
  0x6a   : > { %v1060_v45 = vrot.slane %v1025_v32, 1  ;;  %v1061_v46 = vrot.slane %v1026_v33, 1  ;;  %v610_v47 = vunpack.c.l.bf16 %v594_v29  ;;  %v611_v48 = vunpack.c.h.bf16 %v593_v24 }
  0x6b   : > { %v1009_v50 = vadd.f32 %v1001_v30, %v969_v36  ;;  %v1059_v51 = vsel %vm703_vm1, %v1057_v34, %v1058_v41  ;;  %v612_v52 = vunpack.c.l.bf16 %v596_v35  ;;  %v624_v53 = vmul.f32 %v1693_v38, %v609_v42  ;;  %v1409_v36 = vld [vmem:[%s1705_s18 + $0x38] ss:$8 sps:$4 sm:$0xff]  }
  0x6c   : > { %v1062_v54 = vsel %vm703_vm1, %v1060_v45, %v1061_v46  ;;  %v1085_v55 = vadd.f32 %v1059_v51, %v1008_v37  ;;  %v625_v56 = vmul.f32 %v1693_v38, %v611_v48  ;;  %v643_v57 = vunpack.c.l.bf16 %v1366_v43  ;;  %v1410_v37 = vld [vmem:[%s1705_s18 + $0x3c] sm:$0x1]  ;;  %v1412_v46 = vld [vmem:[%s1705_s18 + $0x44] sm:$0x1]  ;;  %v1420_v51 = vld [vmem:[%s1705_s18 + $0x80] ss:$8 sps:$4 sm:$0xff]  }
  0x6d   : > { %v1086_v58 = vadd.f32 %v1062_v54, %v1009_v50  ;;  %v644_v59 = vunpack.c.h.bf16 %v1366_v43  ;;  %v683_v60 = vmul.f32 %v1703_v40, %v609_v42  ;;  %v684_v61 = vmul.f32 %v1703_v40, %v610_v47 }
  0x6e   : > { %v1100_v62 = vadd.f32 %v1785_v15, %v1085_v55  ;;  %v656_v63 = vmul.f32 %v1698_v39, %v643_v57  ;;  %v685_v1 = vmul.f32 %v1703_v40, %v611_v48  ;;  %v686_v2 = vmul.f32 %v1703_v40, %v612_v52  ;;  %v1393_v40 = vld [vmem:[%s1705_s18 + $0x108] ss:$8 sps:$4 sm:$0xff]  }
  0x6f   : > { %v1101_v38 = vadd.f32 %v1785_v15, %v1086_v58  ;;  %v657_v4 = vmul.f32 %v1698_v39, %v644_v59  ;;  %v722_v5 = vrot.slane %v683_v60, 1  ;;  %v723_v7 = vrot.slane %v684_v61, 1 }
  0x70   : > { %v1108_v9 = vmax.f32 %v1100_v62, 0.0  ;;  %v664_v10 = vadd.f32 %v656_v63, %v624_v53  ;;  %v725_v12 = vrot.slane %v685_v1, 1  ;;  %v726_v13 = vrot.slane %v686_v2, 1 }
  0x71   : > { %v1109_v16 = vmax.f32 %v1101_v38, 0.0  ;;  %v665_v17 = vadd.f32 %v657_v4, %v625_v56  ;;  %v724_v18 = vsel %vm703_vm1, %v722_v5, %v723_v7  ;;  %v775_v19 = vunpack.c.l.bf16 %v1382_v3 }
  0x72   : > { %v1116_v20 = vmin.f32 %v1108_v9, 6.0  ;;  %v727_v21 = vsel %vm703_vm1, %v725_v12, %v726_v13  ;;  %v742_v39 = vadd.f32 %v724_v18, %v664_v10  ;;  %v776_v22 = vunpack.c.l.bf16 %v1383_v8 }
  0x73   : > { %v1117_v23 = vmin.f32 %v1109_v16, 6.0  ;;  %v743_v24 = vadd.f32 %v727_v21, %v665_v17  ;;  %v777_v25 = vunpack.c.h.bf16 %v1382_v3  ;;  %v778_v26 = vunpack.c.l.bf16 %v1385_v14 }
  0x74   : > { %v790_v27 = vmul.f32 %v1725_v0, %v775_v19  ;;  %v817_v28 = vunpack.c.l.bf16 %v1393_v40  ;;  %v818_v29 = vunpack.c.h.bf16 %v1393_v40  ;;  %v857_v30 = vmul.f32 %v1731_v6, %v775_v19 }
  0x75   : > { %v1123_v32 = vpack.c.bf16 %v1117_v23, %v1116_v20  ;;  %v791_v33 = vmul.f32 %v1725_v0, %v777_v25  ;;  %v858_v34 = vmul.f32 %v1731_v6, %v776_v22  ;;  %v859_v35 = vmul.f32 %v1731_v6, %v777_v25 }
  0x76   : > { %v798_v41 = vadd.f32 %v790_v27, %v742_v39  ;;  %v830_v42 = vmul.f32 %v1736_v11, %v817_v28  ;;  %v831_v43 = vmul.f32 %v1736_v11, %v818_v29  ;;  %v860_v45 = vmul.f32 %v1731_v6, %v778_v26 }
  0x77   : > { %1441 = vmatmul.mubr.msk.bf16.vlgmr.msra.gmra.mxu0 %vm1134_vm2, %v1123_v32  ;;  %v799_v47 = vadd.f32 %v791_v33, %v743_v24  ;;  %v895_v48 = vrot.slane %v857_v30, 1  ;;  %v896_v50 = vrot.slane %v858_v34, 1  ;;  %v898_v0 = vrot.slane %v859_v35, 1  ;;  %v1425_v24 = vld [vmem:[%s1967_s4] ss:$0 sm:$0xff] }
  0x78   : > { %v838_v52 = vadd.f32 %v830_v42, %v798_v41  ;;  %v899_v53 = vrot.slane %v860_v45, 1  ;;  %v949_v54 = vunpack.c.l.bf16 %v1409_v36  ;;  %v950_v55 = vunpack.c.l.bf16 %v1410_v37 }
  0x79   : > { %v839_v56 = vadd.f32 %v831_v43, %v799_v47  ;;  %v897_v57 = vsel %vm703_vm1, %v895_v48, %v896_v50  ;;  %v951_v58 = vunpack.c.h.bf16 %v1409_v36  ;;  %v952_v59 = vunpack.c.l.bf16 %v1412_v46 }
  0x7a   : > { %v900_v11 = vsel %vm703_vm1, %v898_v0, %v899_v53  ;;  %v915_v6 = vadd.f32 %v897_v57, %v838_v52  ;;  %v964_v60 = vmul.f32 %v1754_v31, %v949_v54  ;;  %v991_v61 = vunpack.c.l.bf16 %v1420_v51 }
  0x7b   : > { %v916_v62 = vadd.f32 %v900_v11, %v839_v56  ;;  %v965_v63 = vmul.f32 %v1754_v31, %v951_v58  ;;  %v992_v1 = vunpack.c.h.bf16 %v1420_v51  ;;  %v1031_v2 = vmul.f32 %v1760_v44, %v949_v54 }
  0x7c   : > { %v972_v3 = vadd.f32 %v964_v60, %v915_v6  ;;  %v1004_v38 = vmul.f32 %v1767_v49, %v991_v61  ;;  %v1032_v4 = vmul.f32 %v1760_v44, %v950_v55  ;;  %v1033_v5 = vmul.f32 %v1760_v44, %v951_v58 }
  0x7d   : > { %v973_v7 = vadd.f32 %v965_v63, %v916_v62  ;;  %v1005_v8 = vmul.f32 %v1767_v49, %v992_v1  ;;  %v1034_v9 = vmul.f32 %v1760_v44, %v952_v59  ;;  %v1069_v10 = vrot.slane %v1031_v2, 1 }
  0x7e   : > { %v1012_v12 = vadd.f32 %v1004_v38, %v972_v3  ;;  %v1070_v13 = vrot.slane %v1032_v4, 1  ;;  %v1072_v31 = vrot.slane %v1033_v5, 1  ;;  %vm1232_vm3 = vcmask 64512  }
  0x7f   : > { %v1013_v14 = vadd.f32 %v1005_v8, %v973_v7  ;;  %v1073_v16 = vrot.slane %v1034_v9, 1 }
  0x80   : > { %v1071_v17 = vsel %vm703_vm1, %v1069_v10, %v1070_v13 }
  0x81   : > { %v1074_v18 = vsel %vm703_vm1, %v1072_v31, %v1073_v16  ;;  %v1089_v19 = vadd.f32 %v1071_v17, %v1012_v12 }
  0x82   : > { %v1090_v40 = vadd.f32 %v1074_v18, %v1013_v14 }
  0x83   : > { %v1104_v20 = vadd.f32 %v1785_v15, %v1089_v19 }
  0x84   : > { %v1105_v49 = vadd.f32 %v1785_v15, %v1090_v40 }
  0x85   : > { %v1112_v21 = vmax.f32 %v1104_v20, 0.0 }
  0x86   : > { %v1113_v44 = vmax.f32 %v1105_v49, 0.0 }
  0x87   : > { %v1120_v39 = vmin.f32 %v1112_v21, 6.0 }
  0x88   : > { %v1121_v22 = vmin.f32 %v1113_v44, 6.0 }
  0x8a   : > { %v1125_v23 = vpack.c.bf16 %v1121_v22, %v1120_v39 }
  0x8c   : > { %1445 = vmatmul.mubr.msk.bf16.vlgmr.msra.gmra.mxu1 %vm1134_vm2, %v1125_v23 }
 0x137   : > { %v1442_v25 = vpop.f32.mrf.mxu0 }
 0x138   : > { %v1194_v26 = vadd.f32 %v1442_v25, %v1425_v24 }
 0x139   : > { %v1185_v27 = vpop.f32.mrf.mxu0 }
 0x13a   : > { %v1218_v28 = vmax.f32 %v1194_v26, 0.0  ;;  %v1186_v29 = vadd.f32 %v1425_v24, %v1185_v27 }
 0x13b   : > { %v1443_v15 = vpop.f32.mrf.mxu0 }
 0x13c   : > { %v1226_v30 = vmin.f32 %v1218_v28, 6.0  ;;  %v1216_v32 = vmax.f32 %v1186_v29, 0.0  ;;  %v1197_v33 = vadd.f32 %v1443_v15, %v1425_v24 }
 0x13d   : > { %v1188_v34 = vpop.f32.mrf.mxu0 }
 0x13e   : > { %1235 = vst.msk [vmem:[%s1930_s25 + $0x10] sm:$0xff] %vm1232_vm3, %v1226_v30  ;;  %v1224_v35 = vmin.f32 %v1216_v32, 6.0  ;;  %v1219_v36 = vmax.f32 %v1197_v33, 0.0  ;;  %v1189_v37 = vadd.f32 %v1425_v24, %v1188_v34 }
 0x140   : > { %1233 = vst.msk [vmem:[%s1930_s25] sm:$0xff] %vm1232_vm3, %v1224_v35  ;;  %v1227_v41 = vmin.f32 %v1219_v36, 6.0  ;;  %v1217_v42 = vmax.f32 %v1189_v37, 0.0 }
 0x142   : > { %1236 = vst.msk [vmem:[%s1930_s25 + $0x18] sm:$0xff] %vm1232_vm3, %v1227_v41  ;;  %v1225_v43 = vmin.f32 %v1217_v42, 6.0 }
 0x144   : > { %1234 = vst.msk [vmem:[%s1930_s25 + $0x8] sm:$0xff] %vm1232_vm3, %v1225_v43 }
 0x14c   : > { %v1446_v45 = vpop.f32.mrf.mxu1 }
 0x14d   : > { %v1210_v46 = vadd.f32 %v1446_v45, %v1425_v24 }
 0x14e   : > { %v1201_v47 = vpop.f32.mrf.mxu1 }
 0x14f   : > { %v1222_v48 = vmax.f32 %v1210_v46, 0.0  ;;  %v1202_v50 = vadd.f32 %v1425_v24, %v1201_v47 }
 0x150   : > { %v1447_v0 = vpop.f32.mrf.mxu1 }
 0x151   : > { %v1230_v51 = vmin.f32 %v1222_v48, 6.0  ;;  %v1220_v52 = vmax.f32 %v1202_v50, 0.0  ;;  %v1213_v53 = vadd.f32 %v1447_v0, %v1425_v24 }
 0x152   : > { %v1204_v54 = vpop.f32.mrf.mxu1 }
 0x153   : > { %1239 = vst.msk [vmem:[%s1930_s25 + $0x30] sm:$0xff] %vm1232_vm3, %v1230_v51  ;;  %v1228_v55 = vmin.f32 %v1220_v52, 6.0  ;;  %v1223_v56 = vmax.f32 %v1213_v53, 0.0  ;;  %v1205_v57 = vadd.f32 %v1425_v24, %v1204_v54 }
 0x155   : > { %1237 = vst.msk [vmem:[%s1930_s25 + $0x20] sm:$0xff] %vm1232_vm3, %v1228_v55  ;;  %v1231_v58 = vmin.f32 %v1223_v56, 6.0  ;;  %v1221_v59 = vmax.f32 %v1205_v57, 0.0 }
 0x157   : > { %1240 = vst.msk [vmem:[%s1930_s25 + $0x38] sm:$0xff] %vm1232_vm3, %v1231_v58  ;;  %v1229_v11 = vmin.f32 %v1221_v59, 6.0 }
 0x159   : > { %1238 = vst.msk [vmem:[%s1930_s25 + $0x28] sm:$0xff] %vm1232_vm3, %v1229_v11 }
 0x15a PF: > { %s15_s22 = sadd.s32 1, %s1533_s22   ;;  %s1969_s18 = smov %s1521_s19 }
 0x15b   : > { %p12_p10 = scmp.ge.s32.totalorder %s15_s22, 4   ;;  %s1970_s19 = smov %s1600_s26 }
 0x15c   : > { %s1971_s20 = smov %s1529_s21  ;;  %s1972_s21 = smov %s1974_s23 }
 0x15d   :  { %14 = sbr.rel (!%p12_p10) target bundleno = 3 (0x3), region = 122 }

</bundles_post_ra>
